<compile_context>
chip_gen: v7x
topology: tpu7x:2x2x1
jax: 0.10.0
libtpu: 0.0.40
codegen_flags: <defaults>
</compile_context>

<pallas_src>
import math
import functools

import jax
import jax.numpy as jnp
from jax.experimental import pallas as pl
from jax.experimental.pallas import tpu as pltpu


_VMEM_LIMIT = 48 * 1024 * 1024  # fits all generations (v7x has 64 MiB physical)


def _gelu_tanh(x):
    # SwissArmyTransformer gelu_impl (tanh approximation), computed in fp32.
    return 0.5 * x * (1.0 + jnp.tanh(0.7978845608028654 * x * (1.0 + 0.044715 * x * x)))


def _pick_tile(size, target, align):
    """Largest divisor of `size` that is <= target and a multiple of `align`;
    falls back to the full dimension (a full-dim block is always legal)."""
    if size <= target:
        return size
    t = (target // align) * align
    while t >= align:
        if size % t == 0:
            return t
        t -= align
    return size


# ---------------------------------------------------------------------------
# Fused (LayerNorm ->) matmul (+bias, +GELU, +residual) kernel
# ---------------------------------------------------------------------------

def _linear_kernel(*refs, fuse_ln, eps, activation, has_bias, has_res,
                   transpose_w, single_k):
    it = iter(refs)
    x_ref = next(it)
    w_ref = next(it)
    b_ref = next(it) if has_bias else None
    g_ref = next(it) if fuse_ln else None
    bb_ref = next(it) if fuse_ln else None
    r_ref = next(it) if has_res else None
    o_ref = next(it)
    acc_ref = None if single_k else next(it)

    x = x_ref[...]
    if fuse_ln:
        # LayerNorm over the full K row (K is untiled when fuse_ln=True).
        xf = x.astype(jnp.float32)
        mu = jnp.mean(xf, axis=-1, keepdims=True)
        var = jnp.mean(jnp.square(xf - mu), axis=-1, keepdims=True)
        xf = (xf - mu) * jax.lax.rsqrt(var + eps)
        xf = xf * g_ref[...] + bb_ref[...]
        x = xf.astype(w_ref.dtype)

    w = w_ref[...]
    if transpose_w:
        # x: [tm, tk], w: [tn, tk]  ->  x @ w.T without materializing a transpose.
        part = jax.lax.dot_general(x, w, (((1,), (1,)), ((), ())),
                                   preferred_element_type=jnp.float32)
    else:
        part = jnp.dot(x, w, preferred_element_type=jnp.float32)

    def epilogue(y):
        if has_bias:
            y = y + b_ref[...]
        if activation == "gelu":
            y = _gelu_tanh(y)
        if has_res:
            y = y + r_ref[...].astype(jnp.float32)
        o_ref[...] = y.astype(o_ref.dtype)

    if single_k:
        # K axis is a single block: no accumulator scratch / init / finalize.
        epilogue(part)
    else:
        k = pl.program_id(2)

        @pl.when(k == 0)
        def _init():
            acc_ref[...] = jnp.zeros_like(acc_ref)

        acc_ref[...] += part

        @pl.when(k == pl.num_programs(2) - 1)
        def _finalize():
            epilogue(acc_ref[...])


def linear(x2d, w, b=None, *, ln=None, activation=None, residual=None,
           transpose_w=False, out_dtype=None, eps=1e-5,
           tm_target=256, tn_target=512, tk_target=512):
    """y = [residual +] act( LN?(x2d) @ W (+ b) )
    x2d: [M, K]; w: [K, N] (or [N, K] if transpose_w); b: [N] or None;
    residual: [M, N] or None; ln: (gamma, beta) over K or None."""
    M, K = x2d.shape
    if transpose_w:
        N, K2 = w.shape
    else:
        K2, N = w.shape
    assert K == K2
    out_dtype = out_dtype or x2d.dtype

    tm = _pick_tile(M, tm_target, 16)
    tn = _pick_tile(N, tn_target, 128)
    tk = K if ln is not None else _pick_tile(K, tk_target, 128)
    nm, nn, nk = M // tm, N // tn, K // tk
    single_k = (nk == 1)

    in_specs = [pl.BlockSpec((tm, tk), lambda i, j, k: (i, k))]
    args = [x2d]
    if transpose_w:
        in_specs.append(pl.BlockSpec((tn, tk), lambda i, j, k: (j, k)))
    else:
        in_specs.append(pl.BlockSpec((tk, tn), lambda i, j, k: (k, j)))
    args.append(w)

    has_bias = b is not None
    if has_bias:
        in_specs.append(pl.BlockSpec((1, tn), lambda i, j, k: (0, j)))
        args.append(b.reshape(1, N).astype(jnp.float32))
    if ln is not None:
        gamma, beta = ln
        in_specs.append(pl.BlockSpec((1, K), lambda i, j, k: (0, 0)))
        args.append(gamma.reshape(1, K).astype(jnp.float32))
        in_specs.append(pl.BlockSpec((1, K), lambda i, j, k: (0, 0)))
        args.append(beta.reshape(1, K).astype(jnp.float32))
    has_res = residual is not None
    if has_res:
        assert residual.shape == (M, N)
        in_specs.append(pl.BlockSpec((tm, tn), lambda i, j, k: (i, j)))
        args.append(residual)

    kernel = functools.partial(
        _linear_kernel, fuse_ln=ln is not None, eps=eps, activation=activation,
        has_bias=has_bias, has_res=has_res, transpose_w=transpose_w,
        single_k=single_k)

    scratch_shapes = [] if single_k else [pltpu.VMEM((tm, tn), jnp.float32)]

    return pl.pallas_call(
        kernel,
        out_shape=jax.ShapeDtypeStruct((M, N), out_dtype),
        grid_spec=pltpu.PrefetchScalarGridSpec(
            num_scalar_prefetch=0,
            grid=(nm, nn, nk),
            in_specs=in_specs,
            out_specs=pl.BlockSpec((tm, tn), lambda i, j, k: (i, j)),
            scratch_shapes=scratch_shapes),
        compiler_params=pltpu.CompilerParams(
            dimension_semantics=("parallel", "parallel", "arbitrary"),
            vmem_limit_bytes=_VMEM_LIMIT),
    )(*args)


# ---------------------------------------------------------------------------
# Attention kernel: consumes QKV in [B, S, 3H] layout, writes [B, S, H]
# ---------------------------------------------------------------------------

def _attention_kernel(qkv_ref, m_ref, o_ref, *, nH, dh, H, tq, scale):
    # qkv_ref: (1, S, 3H) for the current batch element (resident across q tiles)
    # m_ref:   (1, tq, S)    additive 0/1 mask rows for this query tile
    # o_ref:   (1, tq, H)    lane-dense output slab in [B, S, H] layout
    q_start = pl.multiple_of(pl.program_id(1) * tq, tq)
    mask = m_ref[0].astype(jnp.float32)                      # (tq, S)
    neg = -10000.0 * (1.0 - mask)

    for h in range(nH):
        c0 = h * dh
        # keep q/k/v in their native (bf16) dtype for full-rate MXU matmuls;
        # the 1/sqrt(dh) scale is applied to the fp32 scores after the matmul.
        q = qkv_ref[0, pl.ds(q_start, tq), c0:c0 + dh]                     # (tq, dh)
        k = qkv_ref[0, :, H + c0:H + c0 + dh]                              # (S, dh)
        v = qkv_ref[0, :, 2 * H + c0:2 * H + c0 + dh]                      # (S, dh)
        # scores[i, j] = sum_d q[i, d] * k[j, d]   (no explicit k.T)
        s = jax.lax.dot_general(q, k, (((1,), (1,)), ((), ())),
                                preferred_element_type=jnp.float32)        # (tq, S)
        # SAT standard_attention masking: scores * mask - 10000 * (1 - mask)
        s = (s * scale) * mask + neg
        s = s - jnp.max(s, axis=-1, keepdims=True)
        e = jnp.exp(s)
        p = e * pl.reciprocal(jnp.sum(e, axis=-1, keepdims=True), approx=True)
        ctx = jnp.dot(p.astype(v.dtype), v, preferred_element_type=jnp.float32)
        o_ref[0, :, c0:c0 + dh] = ctx.astype(o_ref.dtype)


def attention_core(qkv, mask, num_heads, *, tq_target=256):
    """qkv: [B, S, 3H] (q|k|v concatenated), mask: [B, S, S] -> ctx: [B, S, H]."""
    B, S, H3 = qkv.shape
    H = H3 // 3
    dh = H // num_heads
    tq = _pick_tile(S, tq_target, 16)
    scale = 1.0 / math.sqrt(dh)
    kernel = functools.partial(_attention_kernel, nH=num_heads, dh=dh, H=H,
                               tq=tq, scale=scale)
    # TODO(synk): for very long sequences, switch to flash-style KV tiling with
    # online softmax (and optionally an in-kernel iota mask) instead of keeping
    # the full [S, 3H] block resident per batch element.
    return pl.pallas_call(
        kernel,
        out_shape=jax.ShapeDtypeStruct((B, S, H), qkv.dtype),
        grid_spec=pltpu.PrefetchScalarGridSpec(
            num_scalar_prefetch=0,
            grid=(B, S // tq),
            in_specs=[
                pl.BlockSpec((1, S, H3), lambda b, qi: (b, 0, 0)),
                pl.BlockSpec((1, tq, S), lambda b, qi: (b, qi, 0)),
            ],
            out_specs=pl.BlockSpec((1, tq, H), lambda b, qi: (b, qi, 0)),
        ),
        compiler_params=pltpu.CompilerParams(
            dimension_semantics=("parallel", "arbitrary"),
            vmem_limit_bytes=_VMEM_LIMIT),
    )(qkv, mask)


# ---------------------------------------------------------------------------
# Parameters (deterministic init; mirrors BaseTransformer __init__ shapes)
# ---------------------------------------------------------------------------

def init_params(key, num_layers, vocab_size, hidden_size, max_sequence_length):
    std = 0.02

    def nrm(k, shape):
        return (std * jax.random.normal(k, shape, jnp.float32)).astype(jnp.bfloat16)

    keys = jax.random.split(key, 2 + num_layers)
    params = {
        "word_emb": nrm(keys[0], (vocab_size, hidden_size)),
        "pos_emb": nrm(keys[1], (max_sequence_length, hidden_size)),
        "final_ln_g": jnp.ones((hidden_size,), jnp.float32),
        "final_ln_b": jnp.zeros((hidden_size,), jnp.float32),
        "layers": [],
    }
    for l in range(num_layers):
        lk = jax.random.split(keys[2 + l], 4)
        params["layers"].append(dict(
            ln1_g=jnp.ones((hidden_size,), jnp.float32),
            ln1_b=jnp.zeros((hidden_size,), jnp.float32),
            qkv_w=nrm(lk[0], (hidden_size, 3 * hidden_size)),
            qkv_b=jnp.zeros((3 * hidden_size,), jnp.float32),
            attn_out_w=nrm(lk[1], (hidden_size, hidden_size)),
            attn_out_b=jnp.zeros((hidden_size,), jnp.float32),
            ln2_g=jnp.ones((hidden_size,), jnp.float32),
            ln2_b=jnp.zeros((hidden_size,), jnp.float32),
            mlp_w1=nrm(lk[2], (hidden_size, 4 * hidden_size)),
            mlp_b1=jnp.zeros((4 * hidden_size,), jnp.float32),
            mlp_w2=nrm(lk[3], (4 * hidden_size, hidden_size)),
            mlp_b2=jnp.zeros((hidden_size,), jnp.float32),
        ))
    return params


# ---------------------------------------------------------------------------
# BaseModel.forward == BaseTransformer.forward (no mixins / default hooks)
# ---------------------------------------------------------------------------

def base_model_forward(params, input_ids, position_ids, attention_mask,
                       num_attention_heads):
    B, S = input_ids.shape
    H = params["word_emb"].shape[1]
    M = B * S

    # word_embedding_forward + position_embedding_forward (gather = XLA glue)
    h = (jnp.take(params["word_emb"], input_ids, axis=0)
         + jnp.take(params["pos_emb"], position_ids, axis=0))
    x2d = h.reshape(M, H).astype(jnp.bfloat16)       # embedding dropout: identity
    mask = attention_mask.reshape(B, S, S)

    for lp in params["layers"]:
        # --- attention_forward (pre-LN): LN1 fused into the QKV matmul ---
        qkv = linear(x2d, lp["qkv_w"], lp["qkv_b"], ln=(lp["ln1_g"], lp["ln1_b"]))
        ctx = attention_core(qkv.reshape(B, S, 3 * H), mask, num_attention_heads)
        # dense out-projection with the residual add fused into the epilogue
        x2d = linear(ctx.reshape(M, H), lp["attn_out_w"], lp["attn_out_b"],
                     residual=x2d)
        # --- mlp_forward: LN2 + GELU fused into h->4h, residual fused into 4h->h ---
        h1 = linear(x2d, lp["mlp_w1"], lp["mlp_b1"],
                    ln=(lp["ln2_g"], lp["ln2_b"]), activation="gelu")
        x2d = linear(h1, lp["mlp_w2"], lp["mlp_b2"], residual=x2d)

    # final_forward: final layernorm fused into logits = hidden @ word_emb.T
    # (parallel_output=True); vocab is tiled on the N grid axis, no bias.
    vocab = params["word_emb"].shape[0]
    logits = linear(x2d, params["word_emb"], None,
                    ln=(params["final_ln_g"], params["final_ln_b"]),
                    transpose_w=True, out_dtype=jnp.float32)
    return logits.reshape(B, S, vocab)


# TODO(synk): mixin hook dispatch (collect_hooks_) is Python-side plumbing with no
# kernel content; the default (hook-less) transformer path is implemented above.


if __name__ == "__main__":
    # small config consistent with BaseTransformer args
    B, S = 2, 8
    num_layers = 2
    hidden_size = 32
    num_attention_heads = 4
    vocab_size = 64
    max_sequence_length = 16

    root = jax.random.PRNGKey(0)
    k_param, k_ids = jax.random.split(root)

    params = init_params(k_param, num_layers, vocab_size, hidden_size,
                         max_sequence_length)

    input_ids = jax.random.randint(k_ids, (B, S), 0, vocab_size, dtype=jnp.int32)
    position_ids = jnp.broadcast_to(jnp.arange(S, dtype=jnp.int32), (B, S))
    # causal attention mask, [B, 1, S, S], 1 = attend
    attention_mask = jnp.broadcast_to(
        jnp.tril(jnp.ones((S, S), jnp.float32)), (B, 1, S, S))

    fwd = jax.jit(base_model_forward, static_argnums=(4,))
    logits = fwd(params, input_ids, position_ids, attention_mask,
                 num_attention_heads)
    logits = jax.block_until_ready(logits)
    assert logits.shape == (B, S, vocab_size)
    assert bool(jnp.all(jnp.isfinite(logits)))
    print("KERNEL_OK")
</pallas_src>

<mosaic_0001>
module attributes {stable_mosaic.version = 11 : i64} {
  func.func @_linear_kernel(%arg0: i32, %arg1: i32, %arg2: i32, %arg3: memref<16x32xbf16, #tpu.memory_space<vmem>>, %arg4: memref<32x96xbf16, #tpu.memory_space<vmem>>, %arg5: memref<1x96xf32, #tpu.memory_space<vmem>>, %arg6: memref<1x32xf32, #tpu.memory_space<vmem>>, %arg7: memref<1x32xf32, #tpu.memory_space<vmem>>, %arg8: memref<16x96xbf16, #tpu.memory_space<vmem>>) attributes {dimension_semantics = [#tpu.dimension_semantics<parallel>, #tpu.dimension_semantics<parallel>, #tpu.dimension_semantics<arbitrary>], iteration_bounds = array<i64: 1, 1, 1>, scalar_prefetch = 0 : i64, scratch_operands = 0 : i64, tpu.core_type = #tpu.core_type<tc>, window_params = [{transform_indices = @transform_0, window_bounds = array<i64: 16, 32>}, {transform_indices = @transform_1, window_bounds = array<i64: 32, 96>}, {transform_indices = @transform_2, window_bounds = array<i64: 1, 96>}, {pipeline_mode = #tpu.pipeline_mode<synchronous>, transform_indices = @transform_3, window_bounds = array<i64: 1, 32>}, {pipeline_mode = #tpu.pipeline_mode<synchronous>, transform_indices = @transform_4, window_bounds = array<i64: 1, 32>}, {transform_indices = @transform_5, window_bounds = array<i64: 16, 96>}]} {
    %c0 = arith.constant 0 : index
    %c0_0 = arith.constant 0 : index
    %0 = vector.load %arg3[%c0, %c0_0] : memref<16x32xbf16, #tpu.memory_space<vmem>>, vector<16x32xbf16>
    %1 = arith.extf %0 : vector<16x32xbf16> to vector<16x32xf32>
    %cst = arith.constant dense<0.000000e+00> : vector<16xf32>
    %2 = vector.multi_reduction <add>, %1, %cst [1] : vector<16x32xf32> to vector<16xf32>
    %3 = vector.shape_cast %2 : vector<16xf32> to vector<16x1xf32>
    %cst_1 = arith.constant 3.200000e+01 : f32
    %4 = vector.broadcast %cst_1 : f32 to vector<16x1xf32>
    %5 = arith.divf %3, %4 : vector<16x1xf32>
    %6 = vector.broadcast %5 : vector<16x1xf32> to vector<16x32xf32>
    %7 = arith.subf %1, %6 : vector<16x32xf32>
    %8 = arith.mulf %7, %7 : vector<16x32xf32>
    %cst_2 = arith.constant dense<0.000000e+00> : vector<16xf32>
    %9 = vector.multi_reduction <add>, %8, %cst_2 [1] : vector<16x32xf32> to vector<16xf32>
    %10 = vector.shape_cast %9 : vector<16xf32> to vector<16x1xf32>
    %cst_3 = arith.constant 3.200000e+01 : f32
    %11 = vector.broadcast %cst_3 : f32 to vector<16x1xf32>
    %12 = arith.divf %10, %11 : vector<16x1xf32>
    %13 = vector.broadcast %5 : vector<16x1xf32> to vector<16x32xf32>
    %14 = arith.subf %1, %13 : vector<16x32xf32>
    %cst_4 = arith.constant 9.99999974E-6 : f32
    %15 = vector.broadcast %cst_4 : f32 to vector<16x1xf32>
    %16 = arith.addf %12, %15 : vector<16x1xf32>
    %17 = math.rsqrt %16 : vector<16x1xf32>
    %18 = vector.broadcast %17 : vector<16x1xf32> to vector<16x32xf32>
    %19 = arith.mulf %14, %18 : vector<16x32xf32>
    %c0_5 = arith.constant 0 : index
    %c0_6 = arith.constant 0 : index
    %20 = vector.load %arg6[%c0_5, %c0_6] : memref<1x32xf32, #tpu.memory_space<vmem>>, vector<1x32xf32>
    %21 = vector.broadcast %20 : vector<1x32xf32> to vector<16x32xf32>
    %22 = arith.mulf %19, %21 : vector<16x32xf32>
    %c0_7 = arith.constant 0 : index
    %c0_8 = arith.constant 0 : index
    %23 = vector.load %arg7[%c0_7, %c0_8] : memref<1x32xf32, #tpu.memory_space<vmem>>, vector<1x32xf32>
    %24 = vector.broadcast %23 : vector<1x32xf32> to vector<16x32xf32>
    %25 = arith.addf %22, %24 : vector<16x32xf32>
    %26 = arith.truncf %25 : vector<16x32xf32> to vector<16x32xbf16>
    %c0_9 = arith.constant 0 : index
    %c0_10 = arith.constant 0 : index
    %27 = vector.load %arg4[%c0_9, %c0_10] : memref<32x96xbf16, #tpu.memory_space<vmem>>, vector<32x96xbf16>
    %cst_11 = arith.constant dense<0.000000e+00> : vector<16x96xf32>
    %28 = tpu.matmul %26, %27, %cst_11 {dimension_numbers = #tpu.dot_dimension_numbers<[1], [0], [0], [1], [0, 0, 1, 1], [], []>} : vector<16x32xbf16>, vector<32x96xbf16>, vector<16x96xf32> -> vector<16x96xf32>
    %c0_12 = arith.constant 0 : index
    %c0_13 = arith.constant 0 : index
    %29 = vector.load %arg5[%c0_12, %c0_13] : memref<1x96xf32, #tpu.memory_space<vmem>>, vector<1x96xf32>
    %30 = vector.broadcast %29 : vector<1x96xf32> to vector<16x96xf32>
    %31 = arith.addf %28, %30 : vector<16x96xf32>
    %32 = arith.truncf %31 : vector<16x96xf32> to vector<16x96xbf16>
    %c0_14 = arith.constant 0 : index
    %c0_15 = arith.constant 0 : index
    %33 = vector.load %arg8[%c0_14, %c0_15] : memref<16x96xbf16, #tpu.memory_space<vmem>>, vector<16x96xbf16>
    tpu.vector_store %arg8[%c0_14, %c0_15], %32 {strides = array<i32>} : memref<16x96xbf16, #tpu.memory_space<vmem>>, vector<16x96xbf16>,
    return
  }
  func.func @transform_0(%arg0: i32, %arg1: i32, %arg2: i32) -> (i32, i32) {
    %c0_i32 = arith.constant 0 : i32
    return %arg0, %arg2 : i32, i32
  }
  func.func @transform_1(%arg0: i32, %arg1: i32, %arg2: i32) -> (i32, i32) {
    %c0_i32 = arith.constant 0 : i32
    return %arg2, %arg1 : i32, i32
  }
  func.func @transform_2(%arg0: i32, %arg1: i32, %arg2: i32) -> (i32, i32) {
    %c0_i32 = arith.constant 0 : i32
    %c0_i32_0 = arith.constant 0 : i32
    return %c0_i32, %arg1 : i32, i32
  }
  func.func @transform_3(%arg0: i32, %arg1: i32, %arg2: i32) -> (i32, i32) {
    %c0_i32 = arith.constant 0 : i32
    %c0_i32_0 = arith.constant 0 : i32
    %c0_i32_1 = arith.constant 0 : i32
    return %c0_i32, %c0_i32_0 : i32, i32
  }
  func.func @transform_4(%arg0: i32, %arg1: i32, %arg2: i32) -> (i32, i32) {
    %c0_i32 = arith.constant 0 : i32
    %c0_i32_0 = arith.constant 0 : i32
    %c0_i32_1 = arith.constant 0 : i32
    return %c0_i32, %c0_i32_0 : i32, i32
  }
  func.func @transform_5(%arg0: i32, %arg1: i32, %arg2: i32) -> (i32, i32) {
    %c0_i32 = arith.constant 0 : i32
    return %arg0, %arg1 : i32, i32
  }
}

module attributes {stable_mosaic.version = 11 : i64} {
  func.func @_attention_kernel(%arg0: i32, %arg1: i32, %arg2: memref<1x8x96xbf16, #tpu.memory_space<vmem>>, %arg3: memref<1x8x8xf32, #tpu.memory_space<vmem>>, %arg4: memref<1x8x32xbf16, #tpu.memory_space<vmem>>) attributes {dimension_semantics = [#tpu.dimension_semantics<parallel>, #tpu.dimension_semantics<arbitrary>], iteration_bounds = array<i64: 2, 1>, scalar_prefetch = 0 : i64, scratch_operands = 0 : i64, tpu.core_type = #tpu.core_type<tc>, window_params = [{transform_indices = @transform_0, window_bounds = array<i64: 1, 8, 96>}, {transform_indices = @transform_1, window_bounds = array<i64: 1, 8, 8>}, {transform_indices = @transform_2, window_bounds = array<i64: 1, 8, 32>}]} {
    %c8_i32 = arith.constant 8 : i32
    %0 = arith.muli %arg1, %c8_i32 : i32
    %1 = tpu.assume_multiple %0, 8 : i32
    %c0 = arith.constant 0 : index
    %c0_0 = arith.constant 0 : index
    %c0_1 = arith.constant 0 : index
    %2 = vector.load %arg3[%c0, %c0_0, %c0_1] : memref<1x8x8xf32, #tpu.memory_space<vmem>>, vector<1x8x8xf32>
    %3 = vector.shape_cast %2 : vector<1x8x8xf32> to vector<8x8xf32>
    %cst = arith.constant 1.000000e+00 : f32
    %4 = vector.broadcast %cst : f32 to vector<8x8xf32>
    %5 = arith.subf %4, %3 : vector<8x8xf32>
    %cst_2 = arith.constant -1.000000e+04 : f32
    %6 = vector.broadcast %cst_2 : f32 to vector<8x8xf32>
    %7 = arith.mulf %6, %5 : vector<8x8xf32>
    %c0_3 = arith.constant 0 : index
    %8 = arith.index_cast %1 : i32 to index
    %c0_4 = arith.constant 0 : index
    %9 = vector.load %arg2[%c0_3, %8, %c0_4] : memref<1x8x96xbf16, #tpu.memory_space<vmem>>, vector<1x8x8xbf16>
    %10 = vector.shape_cast %9 : vector<1x8x8xbf16> to vector<8x8xbf16>
    %c0_5 = arith.constant 0 : index
    %c0_6 = arith.constant 0 : index
    %c32 = arith.constant 32 : index
    %11 = vector.load %arg2[%c0_5, %c0_6, %c32] : memref<1x8x96xbf16, #tpu.memory_space<vmem>>, vector<1x8x8xbf16>
    %12 = vector.shape_cast %11 : vector<1x8x8xbf16> to vector<8x8xbf16>
    %c0_7 = arith.constant 0 : index
    %c0_8 = arith.constant 0 : index
    %c64 = arith.constant 64 : index
    %13 = vector.load %arg2[%c0_7, %c0_8, %c64] : memref<1x8x96xbf16, #tpu.memory_space<vmem>>, vector<1x8x8xbf16>
    %14 = vector.shape_cast %13 : vector<1x8x8xbf16> to vector<8x8xbf16>
    %cst_9 = arith.constant dense<0.000000e+00> : vector<8x8xf32>
    %15 = tpu.matmul %10, %12, %cst_9 {dimension_numbers = #tpu.dot_dimension_numbers<[1], [1], [0], [0], [0, 0, 1, 0], [], []>} : vector<8x8xbf16>, vector<8x8xbf16>, vector<8x8xf32> -> vector<8x8xf32>
    %cst_10 = arith.constant 0.353553385 : f32
    %16 = vector.broadcast %cst_10 : f32 to vector<8x8xf32>
    %17 = arith.mulf %15, %16 : vector<8x8xf32>
    %18 = arith.mulf %17, %3 : vector<8x8xf32>
    %19 = arith.addf %18, %7 : vector<8x8xf32>
    %cst_11 = arith.constant dense<0xFF800000> : vector<8xf32>
    %20 = vector.multi_reduction <maximumf>, %19, %cst_11 [1] : vector<8x8xf32> to vector<8xf32>
    %21 = vector.shape_cast %20 : vector<8xf32> to vector<8x1xf32>
    %22 = vector.broadcast %21 : vector<8x1xf32> to vector<8x8xf32>
    %23 = arith.subf %19, %22 : vector<8x8xf32>
    %24 = math.exp %23 : vector<8x8xf32>
    %cst_12 = arith.constant dense<0.000000e+00> : vector<8xf32>
    %25 = vector.multi_reduction <add>, %24, %cst_12 [1] : vector<8x8xf32> to vector<8xf32>
    %26 = vector.shape_cast %25 : vector<8xf32> to vector<8x1xf32>
    %27 = tpu.reciprocal %26 {approx = true} : vector<8x1xf32> -> vector<8x1xf32>
    %28 = vector.broadcast %27 : vector<8x1xf32> to vector<8x8xf32>
    %29 = arith.mulf %24, %28 : vector<8x8xf32>
    %30 = arith.truncf %29 : vector<8x8xf32> to vector<8x8xbf16>
    %cst_13 = arith.constant dense<0.000000e+00> : vector<8x8xf32>
    %31 = tpu.matmul %30, %14, %cst_13 {dimension_numbers = #tpu.dot_dimension_numbers<[1], [0], [0], [1], [0, 0, 1, 1], [], []>} : vector<8x8xbf16>, vector<8x8xbf16>, vector<8x8xf32> -> vector<8x8xf32>
    %32 = arith.truncf %31 : vector<8x8xf32> to vector<8x8xbf16>
    %c0_14 = arith.constant 0 : index
    %c0_15 = arith.constant 0 : index
    %c0_16 = arith.constant 0 : index
    %33 = vector.load %arg4[%c0_14, %c0_15, %c0_16] : memref<1x8x32xbf16, #tpu.memory_space<vmem>>, vector<1x8x8xbf16>
    %34 = vector.shape_cast %33 : vector<1x8x8xbf16> to vector<8x8xbf16>
    %35 = vector.shape_cast %32 : vector<8x8xbf16> to vector<1x8x8xbf16>
    tpu.vector_store %arg4[%c0_14, %c0_15, %c0_16], %35 {strides = array<i32>} : memref<1x8x32xbf16, #tpu.memory_space<vmem>>, vector<1x8x8xbf16>,
    %c0_17 = arith.constant 0 : index
    %36 = arith.index_cast %1 : i32 to index
    %c8 = arith.constant 8 : index
    %37 = vector.load %arg2[%c0_17, %36, %c8] : memref<1x8x96xbf16, #tpu.memory_space<vmem>>, vector<1x8x8xbf16>
    %38 = vector.shape_cast %37 : vector<1x8x8xbf16> to vector<8x8xbf16>
    %c0_18 = arith.constant 0 : index
    %c0_19 = arith.constant 0 : index
    %c40 = arith.constant 40 : index
    %39 = vector.load %arg2[%c0_18, %c0_19, %c40] : memref<1x8x96xbf16, #tpu.memory_space<vmem>>, vector<1x8x8xbf16>
    %40 = vector.shape_cast %39 : vector<1x8x8xbf16> to vector<8x8xbf16>
    %c0_20 = arith.constant 0 : index
    %c0_21 = arith.constant 0 : index
    %c72 = arith.constant 72 : index
    %41 = vector.load %arg2[%c0_20, %c0_21, %c72] : memref<1x8x96xbf16, #tpu.memory_space<vmem>>, vector<1x8x8xbf16>
    %42 = vector.shape_cast %41 : vector<1x8x8xbf16> to vector<8x8xbf16>
    %cst_22 = arith.constant dense<0.000000e+00> : vector<8x8xf32>
    %43 = tpu.matmul %38, %40, %cst_22 {dimension_numbers = #tpu.dot_dimension_numbers<[1], [1], [0], [0], [0, 0, 1, 0], [], []>} : vector<8x8xbf16>, vector<8x8xbf16>, vector<8x8xf32> -> vector<8x8xf32>
    %cst_23 = arith.constant 0.353553385 : f32
    %44 = vector.broadcast %cst_23 : f32 to vector<8x8xf32>
    %45 = arith.mulf %43, %44 : vector<8x8xf32>
    %46 = arith.mulf %45, %3 : vector<8x8xf32>
    %47 = arith.addf %46, %7 : vector<8x8xf32>
    %cst_24 = arith.constant dense<0xFF800000> : vector<8xf32>
    %48 = vector.multi_reduction <maximumf>, %47, %cst_24 [1] : vector<8x8xf32> to vector<8xf32>
    %49 = vector.shape_cast %48 : vector<8xf32> to vector<8x1xf32>
    %50 = vector.broadcast %49 : vector<8x1xf32> to vector<8x8xf32>
    %51 = arith.subf %47, %50 : vector<8x8xf32>
    %52 = math.exp %51 : vector<8x8xf32>
    %cst_25 = arith.constant dense<0.000000e+00> : vector<8xf32>
    %53 = vector.multi_reduction <add>, %52, %cst_25 [1] : vector<8x8xf32> to vector<8xf32>
    %54 = vector.shape_cast %53 : vector<8xf32> to vector<8x1xf32>
    %55 = tpu.reciprocal %54 {approx = true} : vector<8x1xf32> -> vector<8x1xf32>
    %56 = vector.broadcast %55 : vector<8x1xf32> to vector<8x8xf32>
    %57 = arith.mulf %52, %56 : vector<8x8xf32>
    %58 = arith.truncf %57 : vector<8x8xf32> to vector<8x8xbf16>
    %cst_26 = arith.constant dense<0.000000e+00> : vector<8x8xf32>
    %59 = tpu.matmul %58, %42, %cst_26 {dimension_numbers = #tpu.dot_dimension_numbers<[1], [0], [0], [1], [0, 0, 1, 1], [], []>} : vector<8x8xbf16>, vector<8x8xbf16>, vector<8x8xf32> -> vector<8x8xf32>
    %60 = arith.truncf %59 : vector<8x8xf32> to vector<8x8xbf16>
    %c0_27 = arith.constant 0 : index
    %c0_28 = arith.constant 0 : index
    %c8_29 = arith.constant 8 : index
    %61 = vector.load %arg4[%c0_27, %c0_28, %c8_29] : memref<1x8x32xbf16, #tpu.memory_space<vmem>>, vector<1x8x8xbf16>
    %62 = vector.shape_cast %61 : vector<1x8x8xbf16> to vector<8x8xbf16>
    %63 = vector.shape_cast %60 : vector<8x8xbf16> to vector<1x8x8xbf16>
    tpu.vector_store %arg4[%c0_27, %c0_28, %c8_29], %63 {strides = array<i32>} : memref<1x8x32xbf16, #tpu.memory_space<vmem>>, vector<1x8x8xbf16>,
    %c0_30 = arith.constant 0 : index
    %64 = arith.index_cast %1 : i32 to index
    %c16 = arith.constant 16 : index
    %65 = vector.load %arg2[%c0_30, %64, %c16] : memref<1x8x96xbf16, #tpu.memory_space<vmem>>, vector<1x8x8xbf16>
    %66 = vector.shape_cast %65 : vector<1x8x8xbf16> to vector<8x8xbf16>
    %c0_31 = arith.constant 0 : index
    %c0_32 = arith.constant 0 : index
    %c48 = arith.constant 48 : index
    %67 = vector.load %arg2[%c0_31, %c0_32, %c48] : memref<1x8x96xbf16, #tpu.memory_space<vmem>>, vector<1x8x8xbf16>
    %68 = vector.shape_cast %67 : vector<1x8x8xbf16> to vector<8x8xbf16>
    %c0_33 = arith.constant 0 : index
    %c0_34 = arith.constant 0 : index
    %c80 = arith.constant 80 : index
    %69 = vector.load %arg2[%c0_33, %c0_34, %c80] : memref<1x8x96xbf16, #tpu.memory_space<vmem>>, vector<1x8x8xbf16>
    %70 = vector.shape_cast %69 : vector<1x8x8xbf16> to vector<8x8xbf16>
    %cst_35 = arith.constant dense<0.000000e+00> : vector<8x8xf32>
    %71 = tpu.matmul %66, %68, %cst_35 {dimension_numbers = #tpu.dot_dimension_numbers<[1], [1], [0], [0], [0, 0, 1, 0], [], []>} : vector<8x8xbf16>, vector<8x8xbf16>, vector<8x8xf32> -> vector<8x8xf32>
    %cst_36 = arith.constant 0.353553385 : f32
    %72 = vector.broadcast %cst_36 : f32 to vector<8x8xf32>
    %73 = arith.mulf %71, %72 : vector<8x8xf32>
    %74 = arith.mulf %73, %3 : vector<8x8xf32>
    %75 = arith.addf %74, %7 : vector<8x8xf32>
    %cst_37 = arith.constant dense<0xFF800000> : vector<8xf32>
    %76 = vector.multi_reduction <maximumf>, %75, %cst_37 [1] : vector<8x8xf32> to vector<8xf32>
    %77 = vector.shape_cast %76 : vector<8xf32> to vector<8x1xf32>
    %78 = vector.broadcast %77 : vector<8x1xf32> to vector<8x8xf32>
    %79 = arith.subf %75, %78 : vector<8x8xf32>
    %80 = math.exp %79 : vector<8x8xf32>
    %cst_38 = arith.constant dense<0.000000e+00> : vector<8xf32>
    %81 = vector.multi_reduction <add>, %80, %cst_38 [1] : vector<8x8xf32> to vector<8xf32>
    %82 = vector.shape_cast %81 : vector<8xf32> to vector<8x1xf32>
    %83 = tpu.reciprocal %82 {approx = true} : vector<8x1xf32> -> vector<8x1xf32>
    %84 = vector.broadcast %83 : vector<8x1xf32> to vector<8x8xf32>
    %85 = arith.mulf %80, %84 : vector<8x8xf32>
    %86 = arith.truncf %85 : vector<8x8xf32> to vector<8x8xbf16>
    %cst_39 = arith.constant dense<0.000000e+00> : vector<8x8xf32>
    %87 = tpu.matmul %86, %70, %cst_39 {dimension_numbers = #tpu.dot_dimension_numbers<[1], [0], [0], [1], [0, 0, 1, 1], [], []>} : vector<8x8xbf16>, vector<8x8xbf16>, vector<8x8xf32> -> vector<8x8xf32>
    %88 = arith.truncf %87 : vector<8x8xf32> to vector<8x8xbf16>
    %c0_40 = arith.constant 0 : index
    %c0_41 = arith.constant 0 : index
    %c16_42 = arith.constant 16 : index
    %89 = vector.load %arg4[%c0_40, %c0_41, %c16_42] : memref<1x8x32xbf16, #tpu.memory_space<vmem>>, vector<1x8x8xbf16>
    %90 = vector.shape_cast %89 : vector<1x8x8xbf16> to vector<8x8xbf16>
    %91 = vector.shape_cast %88 : vector<8x8xbf16> to vector<1x8x8xbf16>
    tpu.vector_store %arg4[%c0_40, %c0_41, %c16_42], %91 {strides = array<i32>} : memref<1x8x32xbf16, #tpu.memory_space<vmem>>, vector<1x8x8xbf16>,
    %c0_43 = arith.constant 0 : index
    %92 = arith.index_cast %1 : i32 to index
    %c24 = arith.constant 24 : index
    %93 = vector.load %arg2[%c0_43, %92, %c24] : memref<1x8x96xbf16, #tpu.memory_space<vmem>>, vector<1x8x8xbf16>
    %94 = vector.shape_cast %93 : vector<1x8x8xbf16> to vector<8x8xbf16>
    %c0_44 = arith.constant 0 : index
    %c0_45 = arith.constant 0 : index
    %c56 = arith.constant 56 : index
    %95 = vector.load %arg2[%c0_44, %c0_45, %c56] : memref<1x8x96xbf16, #tpu.memory_space<vmem>>, vector<1x8x8xbf16>
    %96 = vector.shape_cast %95 : vector<1x8x8xbf16> to vector<8x8xbf16>
    %c0_46 = arith.constant 0 : index
    %c0_47 = arith.constant 0 : index
    %c88 = arith.constant 88 : index
    %97 = vector.load %arg2[%c0_46, %c0_47, %c88] : memref<1x8x96xbf16, #tpu.memory_space<vmem>>, vector<1x8x8xbf16>
    %98 = vector.shape_cast %97 : vector<1x8x8xbf16> to vector<8x8xbf16>
    %cst_48 = arith.constant dense<0.000000e+00> : vector<8x8xf32>
    %99 = tpu.matmul %94, %96, %cst_48 {dimension_numbers = #tpu.dot_dimension_numbers<[1], [1], [0], [0], [0, 0, 1, 0], [], []>} : vector<8x8xbf16>, vector<8x8xbf16>, vector<8x8xf32> -> vector<8x8xf32>
    %cst_49 = arith.constant 0.353553385 : f32
    %100 = vector.broadcast %cst_49 : f32 to vector<8x8xf32>
    %101 = arith.mulf %99, %100 : vector<8x8xf32>
    %102 = arith.mulf %101, %3 : vector<8x8xf32>
    %103 = arith.addf %102, %7 : vector<8x8xf32>
    %cst_50 = arith.constant dense<0xFF800000> : vector<8xf32>
    %104 = vector.multi_reduction <maximumf>, %103, %cst_50 [1] : vector<8x8xf32> to vector<8xf32>
    %105 = vector.shape_cast %104 : vector<8xf32> to vector<8x1xf32>
    %106 = vector.broadcast %105 : vector<8x1xf32> to vector<8x8xf32>
    %107 = arith.subf %103, %106 : vector<8x8xf32>
    %108 = math.exp %107 : vector<8x8xf32>
    %cst_51 = arith.constant dense<0.000000e+00> : vector<8xf32>
    %109 = vector.multi_reduction <add>, %108, %cst_51 [1] : vector<8x8xf32> to vector<8xf32>
    %110 = vector.shape_cast %109 : vector<8xf32> to vector<8x1xf32>
    %111 = tpu.reciprocal %110 {approx = true} : vector<8x1xf32> -> vector<8x1xf32>
    %112 = vector.broadcast %111 : vector<8x1xf32> to vector<8x8xf32>
    %113 = arith.mulf %108, %112 : vector<8x8xf32>
    %114 = arith.truncf %113 : vector<8x8xf32> to vector<8x8xbf16>
    %cst_52 = arith.constant dense<0.000000e+00> : vector<8x8xf32>
    %115 = tpu.matmul %114, %98, %cst_52 {dimension_numbers = #tpu.dot_dimension_numbers<[1], [0], [0], [1], [0, 0, 1, 1], [], []>} : vector<8x8xbf16>, vector<8x8xbf16>, vector<8x8xf32> -> vector<8x8xf32>
    %116 = arith.truncf %115 : vector<8x8xf32> to vector<8x8xbf16>
    %c0_53 = arith.constant 0 : index
    %c0_54 = arith.constant 0 : index
    %c24_55 = arith.constant 24 : index
    %117 = vector.load %arg4[%c0_53, %c0_54, %c24_55] : memref<1x8x32xbf16, #tpu.memory_space<vmem>>, vector<1x8x8xbf16>
    %118 = vector.shape_cast %117 : vector<1x8x8xbf16> to vector<8x8xbf16>
    %119 = vector.shape_cast %116 : vector<8x8xbf16> to vector<1x8x8xbf16>
    tpu.vector_store %arg4[%c0_53, %c0_54, %c24_55], %119 {strides = array<i32>} : memref<1x8x32xbf16, #tpu.memory_space<vmem>>, vector<1x8x8xbf16>,
    return
  }
  func.func @transform_0(%arg0: i32, %arg1: i32) -> (i32, i32, i32) {
    %c0_i32 = arith.constant 0 : i32
    %c0_i32_0 = arith.constant 0 : i32
    %c0_i32_1 = arith.constant 0 : i32
    return %arg0, %c0_i32, %c0_i32_0 : i32, i32, i32
  }
  func.func @transform_1(%arg0: i32, %arg1: i32) -> (i32, i32, i32) {
    %c0_i32 = arith.constant 0 : i32
    %c0_i32_0 = arith.constant 0 : i32
    return %arg0, %arg1, %c0_i32 : i32, i32, i32
  }
  func.func @transform_2(%arg0: i32, %arg1: i32) -> (i32, i32, i32) {
    %c0_i32 = arith.constant 0 : i32
    %c0_i32_0 = arith.constant 0 : i32
    return %arg0, %arg1, %c0_i32 : i32, i32, i32
  }
}

module attributes {stable_mosaic.version = 11 : i64} {
  func.func @_linear_kernel(%arg0: i32, %arg1: i32, %arg2: i32, %arg3: memref<16x32xbf16, #tpu.memory_space<vmem>>, %arg4: memref<32x32xbf16, #tpu.memory_space<vmem>>, %arg5: memref<1x32xf32, #tpu.memory_space<vmem>>, %arg6: memref<16x32xbf16, #tpu.memory_space<vmem>>, %arg7: memref<16x32xbf16, #tpu.memory_space<vmem>>) attributes {dimension_semantics = [#tpu.dimension_semantics<parallel>, #tpu.dimension_semantics<parallel>, #tpu.dimension_semantics<arbitrary>], iteration_bounds = array<i64: 1, 1, 1>, scalar_prefetch = 0 : i64, scratch_operands = 0 : i64, tpu.core_type = #tpu.core_type<tc>, window_params = [{transform_indices = @transform_0, window_bounds = array<i64: 16, 32>}, {transform_indices = @transform_1, window_bounds = array<i64: 32, 32>}, {transform_indices = @transform_2, window_bounds = array<i64: 1, 32>}, {transform_indices = @transform_3, window_bounds = array<i64: 16, 32>}, {transform_indices = @transform_4, window_bounds = array<i64: 16, 32>}]} {
    %c0 = arith.constant 0 : index
    %c0_0 = arith.constant 0 : index
    %0 = vector.load %arg3[%c0, %c0_0] : memref<16x32xbf16, #tpu.memory_space<vmem>>, vector<16x32xbf16>
    %c0_1 = arith.constant 0 : index
    %c0_2 = arith.constant 0 : index
    %1 = vector.load %arg4[%c0_1, %c0_2] : memref<32x32xbf16, #tpu.memory_space<vmem>>, vector<32x32xbf16>
    %cst = arith.constant dense<0.000000e+00> : vector<16x32xf32>
    %2 = tpu.matmul %0, %1, %cst {dimension_numbers = #tpu.dot_dimension_numbers<[1], [0], [0], [1], [0, 0, 1, 1], [], []>} : vector<16x32xbf16>, vector<32x32xbf16>, vector<16x32xf32> -> vector<16x32xf32>
    %c0_3 = arith.constant 0 : index
    %c0_4 = arith.constant 0 : index
    %3 = vector.load %arg5[%c0_3, %c0_4] : memref<1x32xf32, #tpu.memory_space<vmem>>, vector<1x32xf32>
    %4 = vector.broadcast %3 : vector<1x32xf32> to vector<16x32xf32>
    %5 = arith.addf %2, %4 : vector<16x32xf32>
    %c0_5 = arith.constant 0 : index
    %c0_6 = arith.constant 0 : index
    %6 = vector.load %arg6[%c0_5, %c0_6] : memref<16x32xbf16, #tpu.memory_space<vmem>>, vector<16x32xbf16>
    %7 = arith.extf %6 : vector<16x32xbf16> to vector<16x32xf32>
    %8 = arith.addf %5, %7 : vector<16x32xf32>
    %9 = arith.truncf %8 : vector<16x32xf32> to vector<16x32xbf16>
    %c0_7 = arith.constant 0 : index
    %c0_8 = arith.constant 0 : index
    %10 = vector.load %arg7[%c0_7, %c0_8] : memref<16x32xbf16, #tpu.memory_space<vmem>>, vector<16x32xbf16>
    tpu.vector_store %arg7[%c0_7, %c0_8], %9 {strides = array<i32>} : memref<16x32xbf16, #tpu.memory_space<vmem>>, vector<16x32xbf16>,
    return
  }
  func.func @transform_0(%arg0: i32, %arg1: i32, %arg2: i32) -> (i32, i32) {
    %c0_i32 = arith.constant 0 : i32
    return %arg0, %arg2 : i32, i32
  }
  func.func @transform_1(%arg0: i32, %arg1: i32, %arg2: i32) -> (i32, i32) {
    %c0_i32 = arith.constant 0 : i32
    return %arg2, %arg1 : i32, i32
  }
  func.func @transform_2(%arg0: i32, %arg1: i32, %arg2: i32) -> (i32, i32) {
    %c0_i32 = arith.constant 0 : i32
    %c0_i32_0 = arith.constant 0 : i32
    return %c0_i32, %arg1 : i32, i32
  }
  func.func @transform_3(%arg0: i32, %arg1: i32, %arg2: i32) -> (i32, i32) {
    %c0_i32 = arith.constant 0 : i32
    return %arg0, %arg1 : i32, i32
  }
  func.func @transform_4(%arg0: i32, %arg1: i32, %arg2: i32) -> (i32, i32) {
    %c0_i32 = arith.constant 0 : i32
    return %arg0, %arg1 : i32, i32
  }
}

module attributes {stable_mosaic.version = 11 : i64} {
  func.func @_linear_kernel(%arg0: i32, %arg1: i32, %arg2: i32, %arg3: memref<16x32xbf16, #tpu.memory_space<vmem>>, %arg4: memref<32x128xbf16, #tpu.memory_space<vmem>>, %arg5: memref<1x128xf32, #tpu.memory_space<vmem>>, %arg6: memref<1x32xf32, #tpu.memory_space<vmem>>, %arg7: memref<1x32xf32, #tpu.memory_space<vmem>>, %arg8: memref<16x128xbf16, #tpu.memory_space<vmem>>) attributes {dimension_semantics = [#tpu.dimension_semantics<parallel>, #tpu.dimension_semantics<parallel>, #tpu.dimension_semantics<arbitrary>], iteration_bounds = array<i64: 1, 1, 1>, scalar_prefetch = 0 : i64, scratch_operands = 0 : i64, tpu.core_type = #tpu.core_type<tc>, window_params = [{transform_indices = @transform_0, window_bounds = array<i64: 16, 32>}, {transform_indices = @transform_1, window_bounds = array<i64: 32, 128>}, {transform_indices = @transform_2, window_bounds = array<i64: 1, 128>}, {pipeline_mode = #tpu.pipeline_mode<synchronous>, transform_indices = @transform_3, window_bounds = array<i64: 1, 32>}, {pipeline_mode = #tpu.pipeline_mode<synchronous>, transform_indices = @transform_4, window_bounds = array<i64: 1, 32>}, {transform_indices = @transform_5, window_bounds = array<i64: 16, 128>}]} {
    %c0 = arith.constant 0 : index
    %c0_0 = arith.constant 0 : index
    %0 = vector.load %arg3[%c0, %c0_0] : memref<16x32xbf16, #tpu.memory_space<vmem>>, vector<16x32xbf16>
    %1 = arith.extf %0 : vector<16x32xbf16> to vector<16x32xf32>
    %cst = arith.constant dense<0.000000e+00> : vector<16xf32>
    %2 = vector.multi_reduction <add>, %1, %cst [1] : vector<16x32xf32> to vector<16xf32>
    %3 = vector.shape_cast %2 : vector<16xf32> to vector<16x1xf32>
    %cst_1 = arith.constant 3.200000e+01 : f32
    %4 = vector.broadcast %cst_1 : f32 to vector<16x1xf32>
    %5 = arith.divf %3, %4 : vector<16x1xf32>
    %6 = vector.broadcast %5 : vector<16x1xf32> to vector<16x32xf32>
    %7 = arith.subf %1, %6 : vector<16x32xf32>
    %8 = arith.mulf %7, %7 : vector<16x32xf32>
    %cst_2 = arith.constant dense<0.000000e+00> : vector<16xf32>
    %9 = vector.multi_reduction <add>, %8, %cst_2 [1] : vector<16x32xf32> to vector<16xf32>
    %10 = vector.shape_cast %9 : vector<16xf32> to vector<16x1xf32>
    %cst_3 = arith.constant 3.200000e+01 : f32
    %11 = vector.broadcast %cst_3 : f32 to vector<16x1xf32>
    %12 = arith.divf %10, %11 : vector<16x1xf32>
    %13 = vector.broadcast %5 : vector<16x1xf32> to vector<16x32xf32>
    %14 = arith.subf %1, %13 : vector<16x32xf32>
    %cst_4 = arith.constant 9.99999974E-6 : f32
    %15 = vector.broadcast %cst_4 : f32 to vector<16x1xf32>
    %16 = arith.addf %12, %15 : vector<16x1xf32>
    %17 = math.rsqrt %16 : vector<16x1xf32>
    %18 = vector.broadcast %17 : vector<16x1xf32> to vector<16x32xf32>
    %19 = arith.mulf %14, %18 : vector<16x32xf32>
    %c0_5 = arith.constant 0 : index
    %c0_6 = arith.constant 0 : index
    %20 = vector.load %arg6[%c0_5, %c0_6] : memref<1x32xf32, #tpu.memory_space<vmem>>, vector<1x32xf32>
    %21 = vector.broadcast %20 : vector<1x32xf32> to vector<16x32xf32>
    %22 = arith.mulf %19, %21 : vector<16x32xf32>
    %c0_7 = arith.constant 0 : index
    %c0_8 = arith.constant 0 : index
    %23 = vector.load %arg7[%c0_7, %c0_8] : memref<1x32xf32, #tpu.memory_space<vmem>>, vector<1x32xf32>
    %24 = vector.broadcast %23 : vector<1x32xf32> to vector<16x32xf32>
    %25 = arith.addf %22, %24 : vector<16x32xf32>
    %26 = arith.truncf %25 : vector<16x32xf32> to vector<16x32xbf16>
    %c0_9 = arith.constant 0 : index
    %c0_10 = arith.constant 0 : index
    %27 = vector.load %arg4[%c0_9, %c0_10] : memref<32x128xbf16, #tpu.memory_space<vmem>>, vector<32x128xbf16>
    %cst_11 = arith.constant dense<0.000000e+00> : vector<16x128xf32>
    %28 = tpu.matmul %26, %27, %cst_11 {dimension_numbers = #tpu.dot_dimension_numbers<[1], [0], [0], [1], [0, 0, 1, 1], [], []>} : vector<16x32xbf16>, vector<32x128xbf16>, vector<16x128xf32> -> vector<16x128xf32>
    %c0_12 = arith.constant 0 : index
    %c0_13 = arith.constant 0 : index
    %29 = vector.load %arg5[%c0_12, %c0_13] : memref<1x128xf32, #tpu.memory_space<vmem>>, vector<1x128xf32>
    %30 = vector.broadcast %29 : vector<1x128xf32> to vector<16x128xf32>
    %31 = arith.addf %28, %30 : vector<16x128xf32>
    %cst_14 = arith.constant 5.000000e-01 : f32
    %32 = vector.broadcast %cst_14 : f32 to vector<16x128xf32>
    %33 = arith.mulf %32, %31 : vector<16x128xf32>
    %cst_15 = arith.constant 0.797884583 : f32
    %34 = vector.broadcast %cst_15 : f32 to vector<16x128xf32>
    %35 = arith.mulf %34, %31 : vector<16x128xf32>
    %cst_16 = arith.constant 4.471500e-02 : f32
    %36 = vector.broadcast %cst_16 : f32 to vector<16x128xf32>
    %37 = arith.mulf %36, %31 : vector<16x128xf32>
    %38 = arith.mulf %37, %31 : vector<16x128xf32>
    %cst_17 = arith.constant 1.000000e+00 : f32
    %39 = vector.broadcast %cst_17 : f32 to vector<16x128xf32>
    %40 = arith.addf %39, %38 : vector<16x128xf32>
    %41 = arith.mulf %35, %40 : vector<16x128xf32>
    %42 = math.tanh %41 : vector<16x128xf32>
    %cst_18 = arith.constant 1.000000e+00 : f32
    %43 = vector.broadcast %cst_18 : f32 to vector<16x128xf32>
    %44 = arith.addf %43, %42 : vector<16x128xf32>
    %45 = arith.mulf %33, %44 : vector<16x128xf32>
    %46 = arith.truncf %45 : vector<16x128xf32> to vector<16x128xbf16>
    %c0_19 = arith.constant 0 : index
    %c0_20 = arith.constant 0 : index
    %47 = vector.load %arg8[%c0_19, %c0_20] : memref<16x128xbf16, #tpu.memory_space<vmem>>, vector<16x128xbf16>
    tpu.vector_store %arg8[%c0_19, %c0_20], %46 {strides = array<i32>} : memref<16x128xbf16, #tpu.memory_space<vmem>>, vector<16x128xbf16>,
    return
  }
  func.func @transform_0(%arg0: i32, %arg1: i32, %arg2: i32) -> (i32, i32) {
    %c0_i32 = arith.constant 0 : i32
    return %arg0, %arg2 : i32, i32
  }
  func.func @transform_1(%arg0: i32, %arg1: i32, %arg2: i32) -> (i32, i32) {
    %c0_i32 = arith.constant 0 : i32
    return %arg2, %arg1 : i32, i32
  }
  func.func @transform_2(%arg0: i32, %arg1: i32, %arg2: i32) -> (i32, i32) {
    %c0_i32 = arith.constant 0 : i32
    %c0_i32_0 = arith.constant 0 : i32
    return %c0_i32, %arg1 : i32, i32
  }
  func.func @transform_3(%arg0: i32, %arg1: i32, %arg2: i32) -> (i32, i32) {
    %c0_i32 = arith.constant 0 : i32
    %c0_i32_0 = arith.constant 0 : i32
    %c0_i32_1 = arith.constant 0 : i32
    return %c0_i32, %c0_i32_0 : i32, i32
  }
  func.func @transform_4(%arg0: i32, %arg1: i32, %arg2: i32) -> (i32, i32) {
    %c0_i32 = arith.constant 0 : i32
    %c0_i32_0 = arith.constant 0 : i32
    %c0_i32_1 = arith.constant 0 : i32
    return %c0_i32, %c0_i32_0 : i32, i32
  }
  func.func @transform_5(%arg0: i32, %arg1: i32, %arg2: i32) -> (i32, i32) {
    %c0_i32 = arith.constant 0 : i32
    return %arg0, %arg1 : i32, i32
  }
}

module attributes {stable_mosaic.version = 11 : i64} {
  func.func @_linear_kernel(%arg0: i32, %arg1: i32, %arg2: i32, %arg3: memref<16x128xbf16, #tpu.memory_space<vmem>>, %arg4: memref<128x32xbf16, #tpu.memory_space<vmem>>, %arg5: memref<1x32xf32, #tpu.memory_space<vmem>>, %arg6: memref<16x32xbf16, #tpu.memory_space<vmem>>, %arg7: memref<16x32xbf16, #tpu.memory_space<vmem>>) attributes {dimension_semantics = [#tpu.dimension_semantics<parallel>, #tpu.dimension_semantics<parallel>, #tpu.dimension_semantics<arbitrary>], iteration_bounds = array<i64: 1, 1, 1>, scalar_prefetch = 0 : i64, scratch_operands = 0 : i64, tpu.core_type = #tpu.core_type<tc>, window_params = [{transform_indices = @transform_0, window_bounds = array<i64: 16, 128>}, {transform_indices = @transform_1, window_bounds = array<i64: 128, 32>}, {transform_indices = @transform_2, window_bounds = array<i64: 1, 32>}, {transform_indices = @transform_3, window_bounds = array<i64: 16, 32>}, {transform_indices = @transform_4, window_bounds = array<i64: 16, 32>}]} {
    %c0 = arith.constant 0 : index
    %c0_0 = arith.constant 0 : index
    %0 = vector.load %arg3[%c0, %c0_0] : memref<16x128xbf16, #tpu.memory_space<vmem>>, vector<16x128xbf16>
    %c0_1 = arith.constant 0 : index
    %c0_2 = arith.constant 0 : index
    %1 = vector.load %arg4[%c0_1, %c0_2] : memref<128x32xbf16, #tpu.memory_space<vmem>>, vector<128x32xbf16>
    %cst = arith.constant dense<0.000000e+00> : vector<16x32xf32>
    %2 = tpu.matmul %0, %1, %cst {dimension_numbers = #tpu.dot_dimension_numbers<[1], [0], [0], [1], [0, 0, 1, 1], [], []>} : vector<16x128xbf16>, vector<128x32xbf16>, vector<16x32xf32> -> vector<16x32xf32>
    %c0_3 = arith.constant 0 : index
    %c0_4 = arith.constant 0 : index
    %3 = vector.load %arg5[%c0_3, %c0_4] : memref<1x32xf32, #tpu.memory_space<vmem>>, vector<1x32xf32>
    %4 = vector.broadcast %3 : vector<1x32xf32> to vector<16x32xf32>
    %5 = arith.addf %2, %4 : vector<16x32xf32>
    %c0_5 = arith.constant 0 : index
    %c0_6 = arith.constant 0 : index
    %6 = vector.load %arg6[%c0_5, %c0_6] : memref<16x32xbf16, #tpu.memory_space<vmem>>, vector<16x32xbf16>
    %7 = arith.extf %6 : vector<16x32xbf16> to vector<16x32xf32>
    %8 = arith.addf %5, %7 : vector<16x32xf32>
    %9 = arith.truncf %8 : vector<16x32xf32> to vector<16x32xbf16>
    %c0_7 = arith.constant 0 : index
    %c0_8 = arith.constant 0 : index
    %10 = vector.load %arg7[%c0_7, %c0_8] : memref<16x32xbf16, #tpu.memory_space<vmem>>, vector<16x32xbf16>
    tpu.vector_store %arg7[%c0_7, %c0_8], %9 {strides = array<i32>} : memref<16x32xbf16, #tpu.memory_space<vmem>>, vector<16x32xbf16>,
    return
  }
  func.func @transform_0(%arg0: i32, %arg1: i32, %arg2: i32) -> (i32, i32) {
    %c0_i32 = arith.constant 0 : i32
    return %arg0, %arg2 : i32, i32
  }
  func.func @transform_1(%arg0: i32, %arg1: i32, %arg2: i32) -> (i32, i32) {
    %c0_i32 = arith.constant 0 : i32
    return %arg2, %arg1 : i32, i32
  }
  func.func @transform_2(%arg0: i32, %arg1: i32, %arg2: i32) -> (i32, i32) {
    %c0_i32 = arith.constant 0 : i32
    %c0_i32_0 = arith.constant 0 : i32
    return %c0_i32, %arg1 : i32, i32
  }
  func.func @transform_3(%arg0: i32, %arg1: i32, %arg2: i32) -> (i32, i32) {
    %c0_i32 = arith.constant 0 : i32
    return %arg0, %arg1 : i32, i32
  }
  func.func @transform_4(%arg0: i32, %arg1: i32, %arg2: i32) -> (i32, i32) {
    %c0_i32 = arith.constant 0 : i32
    return %arg0, %arg1 : i32, i32
  }
}

module attributes {stable_mosaic.version = 11 : i64} {
  func.func @_linear_kernel(%arg0: i32, %arg1: i32, %arg2: i32, %arg3: memref<16x32xbf16, #tpu.memory_space<vmem>>, %arg4: memref<64x32xbf16, #tpu.memory_space<vmem>>, %arg5: memref<1x32xf32, #tpu.memory_space<vmem>>, %arg6: memref<1x32xf32, #tpu.memory_space<vmem>>, %arg7: memref<16x64xf32, #tpu.memory_space<vmem>>) attributes {dimension_semantics = [#tpu.dimension_semantics<parallel>, #tpu.dimension_semantics<parallel>, #tpu.dimension_semantics<arbitrary>], iteration_bounds = array<i64: 1, 1, 1>, scalar_prefetch = 0 : i64, scratch_operands = 0 : i64, tpu.core_type = #tpu.core_type<tc>, window_params = [{transform_indices = @transform_0, window_bounds = array<i64: 16, 32>}, {transform_indices = @transform_1, window_bounds = array<i64: 64, 32>}, {pipeline_mode = #tpu.pipeline_mode<synchronous>, transform_indices = @transform_2, window_bounds = array<i64: 1, 32>}, {pipeline_mode = #tpu.pipeline_mode<synchronous>, transform_indices = @transform_3, window_bounds = array<i64: 1, 32>}, {transform_indices = @transform_4, window_bounds = array<i64: 16, 64>}]} {
    %c0 = arith.constant 0 : index
    %c0_0 = arith.constant 0 : index
    %0 = vector.load %arg3[%c0, %c0_0] : memref<16x32xbf16, #tpu.memory_space<vmem>>, vector<16x32xbf16>
    %1 = arith.extf %0 : vector<16x32xbf16> to vector<16x32xf32>
    %cst = arith.constant dense<0.000000e+00> : vector<16xf32>
    %2 = vector.multi_reduction <add>, %1, %cst [1] : vector<16x32xf32> to vector<16xf32>
    %3 = vector.shape_cast %2 : vector<16xf32> to vector<16x1xf32>
    %cst_1 = arith.constant 3.200000e+01 : f32
    %4 = vector.broadcast %cst_1 : f32 to vector<16x1xf32>
    %5 = arith.divf %3, %4 : vector<16x1xf32>
    %6 = vector.broadcast %5 : vector<16x1xf32> to vector<16x32xf32>
    %7 = arith.subf %1, %6 : vector<16x32xf32>
    %8 = arith.mulf %7, %7 : vector<16x32xf32>
    %cst_2 = arith.constant dense<0.000000e+00> : vector<16xf32>
    %9 = vector.multi_reduction <add>, %8, %cst_2 [1] : vector<16x32xf32> to vector<16xf32>
    %10 = vector.shape_cast %9 : vector<16xf32> to vector<16x1xf32>
    %cst_3 = arith.constant 3.200000e+01 : f32
    %11 = vector.broadcast %cst_3 : f32 to vector<16x1xf32>
    %12 = arith.divf %10, %11 : vector<16x1xf32>
    %13 = vector.broadcast %5 : vector<16x1xf32> to vector<16x32xf32>
    %14 = arith.subf %1, %13 : vector<16x32xf32>
    %cst_4 = arith.constant 9.99999974E-6 : f32
    %15 = vector.broadcast %cst_4 : f32 to vector<16x1xf32>
    %16 = arith.addf %12, %15 : vector<16x1xf32>
    %17 = math.rsqrt %16 : vector<16x1xf32>
    %18 = vector.broadcast %17 : vector<16x1xf32> to vector<16x32xf32>
    %19 = arith.mulf %14, %18 : vector<16x32xf32>
    %c0_5 = arith.constant 0 : index
    %c0_6 = arith.constant 0 : index
    %20 = vector.load %arg5[%c0_5, %c0_6] : memref<1x32xf32, #tpu.memory_space<vmem>>, vector<1x32xf32>
    %21 = vector.broadcast %20 : vector<1x32xf32> to vector<16x32xf32>
    %22 = arith.mulf %19, %21 : vector<16x32xf32>
    %c0_7 = arith.constant 0 : index
    %c0_8 = arith.constant 0 : index
    %23 = vector.load %arg6[%c0_7, %c0_8] : memref<1x32xf32, #tpu.memory_space<vmem>>, vector<1x32xf32>
    %24 = vector.broadcast %23 : vector<1x32xf32> to vector<16x32xf32>
    %25 = arith.addf %22, %24 : vector<16x32xf32>
    %26 = arith.truncf %25 : vector<16x32xf32> to vector<16x32xbf16>
    %c0_9 = arith.constant 0 : index
    %c0_10 = arith.constant 0 : index
    %27 = vector.load %arg4[%c0_9, %c0_10] : memref<64x32xbf16, #tpu.memory_space<vmem>>, vector<64x32xbf16>
    %cst_11 = arith.constant dense<0.000000e+00> : vector<16x64xf32>
    %28 = tpu.matmul %26, %27, %cst_11 {dimension_numbers = #tpu.dot_dimension_numbers<[1], [1], [0], [0], [0, 0, 1, 0], [], []>} : vector<16x32xbf16>, vector<64x32xbf16>, vector<16x64xf32> -> vector<16x64xf32>
    %c0_12 = arith.constant 0 : index
    %c0_13 = arith.constant 0 : index
    %29 = vector.load %arg7[%c0_12, %c0_13] : memref<16x64xf32, #tpu.memory_space<vmem>>, vector<16x64xf32>
    tpu.vector_store %arg7[%c0_12, %c0_13], %28 {strides = array<i32>} : memref<16x64xf32, #tpu.memory_space<vmem>>, vector<16x64xf32>,
    return
  }
  func.func @transform_0(%arg0: i32, %arg1: i32, %arg2: i32) -> (i32, i32) {
    %c0_i32 = arith.constant 0 : i32
    return %arg0, %arg2 : i32, i32
  }
  func.func @transform_1(%arg0: i32, %arg1: i32, %arg2: i32) -> (i32, i32) {
    %c0_i32 = arith.constant 0 : i32
    return %arg1, %arg2 : i32, i32
  }
  func.func @transform_2(%arg0: i32, %arg1: i32, %arg2: i32) -> (i32, i32) {
    %c0_i32 = arith.constant 0 : i32
    %c0_i32_0 = arith.constant 0 : i32
    %c0_i32_1 = arith.constant 0 : i32
    return %c0_i32, %c0_i32_0 : i32, i32
  }
  func.func @transform_3(%arg0: i32, %arg1: i32, %arg2: i32) -> (i32, i32) {
    %c0_i32 = arith.constant 0 : i32
    %c0_i32_0 = arith.constant 0 : i32
    %c0_i32_1 = arith.constant 0 : i32
    return %c0_i32, %c0_i32_0 : i32, i32
  }
  func.func @transform_4(%arg0: i32, %arg1: i32, %arg2: i32) -> (i32, i32) {
    %c0_i32 = arith.constant 0 : i32
    return %arg0, %arg1 : i32, i32
  }
}

</mosaic_0001>

<bundles_post_ra>
// kernel: base_model_forward.11
= control target key start
LH: loop header
LB: loop body
LE: loop exit
PB: predicated region body
PF: predicated region fallthrough
CT: control target
= control target key end

     0   :  { %vm25_vm0 = vcmask 261120   ;;  %v187_v16 = vmov 0.0   ;;  %vm188_vm1 = vmmov 0   ;;  %vm147_vm2 = vcmask 781312   ;;  %s248_s0 = inlined_call_operand.vmem [shape: bf16[16,32], index: 0, kind: input, shape index: {}]   ;;  %s249_s1 = inlined_call_operand.vmem [shape: bf16[32,96], index: 1, kind: input, shape index: {}]   ;;  %s250_s3 = inlined_call_operand.vmem [shape: f32[1,32], index: 3, kind: input, shape index: {}]   ;;  %s251_s4 = inlined_call_operand.vmem [shape: f32[1,32], index: 4, kind: input, shape index: {}]   ;;  %s252_s2 = inlined_call_operand.vmem [shape: f32[1,96], index: 2, kind: input, shape index: {}]   ;;  %s253_s5 = inlined_call_operand.vmem [shape: bf16[16,96], index: 5, kind: output, shape index: {}]  }
   0x1   :  { %v165_v0 = vld [vmem:[%s248_s0] sm:$0xff]   ;;  %171 = vmatprep.subr.bf16.mxu0 %v187_v16  ;;  %v182_v17 = vld [vmem:[%s249_s1 + $0x8] sm:$0xff]   ;;  %175 = vmatprep.mubr.msk.bf16.mxu0 %vm188_vm1, %v187_v16 }
   0x2   :  { %v166_v1 = vunpack.c.l.bf16 %v165_v0  ;;  %v167_v2 = vunpack.c.h.bf16 %v165_v0  ;;  %v181_v15 = vld [vmem:[%s249_s1] sm:$0xff]  }
   0x3   :  { %172 = vmatpush3.bf16.msra.mxu0 %v181_v15  ;;  %v154_v26 = vld [vmem:[%s250_s3] ss:$0 sm:$0xff] }
   0x4   :  { %v26_v3 = vsel %vm25_vm0, %v166_v1, 0.0  ;;  %v29_v4 = vsel %vm25_vm0, %v167_v2, 0.0  ;;  %173 = vmatprep.subr.bf16.mxu0 %v187_v16  ;;  %v155_v30 = vld [vmem:[%s251_s4] ss:$0 sm:$0xff] }
   0x5   :  { %27 = vadd.xlane.f32.xlu0 %v26_v3  ;;  %v156_v35 = vld [vmem:[%s252_s2] ss:$0 sm:$0xff] }
   0x7   :  { %174 = vmatpush3.bf16.msra.mxu0 %v182_v17 }
   0x9   :  { %30 = vadd.xlane.f32.xlu0 %v29_v4 }
  0x92   :  { %v28_v5 = vpop.xlane.xlu0 %27 }
  0x93   :  { %v33_v6 = vmul.f32 0.03125, %v28_v5 }
  0x95   :  { %v35_v7 = vsub.f32 %v166_v1, %v33_v6 }
  0x96   :  { %v31_v8 = vpop.xlane.xlu0 %30 }
  0x97   :  { %v34_v9 = vmul.f32 0.03125, %v31_v8  ;;  %v37_v10 = vmul.f32 %v35_v7, %v35_v7 }
  0x99   :  { %v36_v11 = vsub.f32 %v167_v2, %v34_v9  ;;  %v39_v12 = vsel %vm25_vm0, %v37_v10, 0.0 }
  0x9a   :  { %40 = vadd.xlane.f32.xlu1 %v39_v12 }
  0x9b   :  { %v38_v13 = vmul.f32 %v36_v11, %v36_v11 }
  0x9d   :  { %v42_v14 = vsel %vm25_vm0, %v38_v13, 0.0 }
  0x9e   :  { %43 = vadd.xlane.f32.xlu1 %v42_v14 }
 0x127   :  { %v41_v18 = vpop.xlane.xlu1 %40 }
 0x128   :  { %v45_v19 = vmul.f32 0.03125, %v41_v18 }
 0x12a   :  { %v47_v20 = vadd.f32 1e-05, %v45_v19 }
 0x12b   :  { %v44_v21 = vpop.xlane.xlu1 %43 }
 0x12c   :  { %183 = vrsqrt.f32 %v47_v20  ;;  %v46_v22 = vmul.f32 0.03125, %v44_v21 }
 0x12e   :  { %v48_v23 = vadd.f32 1e-05, %v46_v22 }
 0x130   :  { %185 = vrsqrt.f32 %v48_v23 }
 0x136   :  { %v184_v24 = vpop.eup %183 }
 0x137   :  { %v51_v25 = vmul.f32 %v184_v24, %v35_v7 }
 0x139   :  { %v60_v29 = vmul.f32 %v154_v26, %v51_v25 }
 0x13a   :  { %v186_v27 = vpop.eup %185 }
 0x13b   :  { %v52_v28 = vmul.f32 %v186_v27, %v36_v11  ;;  %v69_v32 = vadd.f32 %v155_v30, %v60_v29 }
 0x13d   :  { %v61_v31 = vmul.f32 %v154_v26, %v52_v28 }
 0x13f   :  { %v70_v33 = vadd.f32 %v155_v30, %v61_v31 }
 0x141   :  { %v71_v34 = vpack.c.bf16 %v70_v33, %v69_v32 }
 0x143   :  { %176 = vmatmul.mubr.msk.bf16.vlgmr.msra.gmra.mrb[0].mxu0 %vm25_vm0, %v71_v34 }
 0x216   :  { %v132_v36 = vpop.f32.mrb[0].mxu0 }
 0x217   :  { %v133_v37 = vadd.f32 %v156_v35, %v132_v36  ;;  %v177_v38 = vpop.f32.mrb[1].mxu0 }
 0x218   :  { %v135_v39 = vpop.f32.mrb[2].mxu0 }
 0x219   :  { %v162_v40 = vpack.c.bf16 %v133_v37, %v133_v37  ;;  %v136_v41 = vadd.f32 %v156_v35, %v135_v39  ;;  %v178_v42 = vpop.f32.mrb[3].mxu0 }
 0x21b   :  { %148 = vst.msk [vmem:[%s253_s5] sm:$0xf] %vm147_vm2, %v162_v40  ;;  %v163_v43 = vpack.c.bf16 %v136_v41, %v136_v41 }
 0x21d   :  { %149 = vst.msk [vmem:[%s253_s5 + $0x4] sm:$0xf] %vm147_vm2, %v163_v43 }

// kernel: base_model_forward.13
= control target key start
LH: loop header
LB: loop body
LE: loop exit
PB: predicated region body
PF: predicated region fallthrough
CT: control target
= control target key end

     0   :  { %v143_v0 = vmov 0.0   ;;  %vm144_vm0 = vmmov 0   ;;  %vm48_vm1 = vcmask 261120   ;;  %vm107_vm2 = vcmask 257024   ;;  %s191_s1 = inlined_call_operand.vmem [shape: bf16[32,32], index: 1, kind: input, shape index: {}]   ;;  %s192_s0 = inlined_call_operand.vmem [shape: bf16[16,32], index: 0, kind: input, shape index: {}]   ;;  %s193_s3 = inlined_call_operand.vmem [shape: bf16[16,32], index: 3, kind: input, shape index: {}]   ;;  %s194_s2 = inlined_call_operand.vmem [shape: f32[1,32], index: 2, kind: input, shape index: {}]   ;;  %s195_s4 = inlined_call_operand.vmem [shape: bf16[16,32], index: 4, kind: output, shape index: {}]  }
   0x1   :  { %130 = vmatprep.subr.bf16.mxu0 %v143_v0  ;;  %v140_v1 = vld [vmem:[%s191_s1] sm:$0xff]   ;;  %134 = vmatprep.mubr.msk.bf16.mxu0 %vm144_vm0, %v143_v0  ;;  %v141_v2 = vld [vmem:[%s191_s1 + $0x8] sm:$0xff]  }
   0x2   :  { %131 = vmatpush3.bf16.msra.mxu0 %v140_v1  ;;  %v142_v3 = vld [vmem:[%s192_s0] sm:$0xff]  }
   0x3   :  { %132 = vmatprep.subr.bf16.mxu0 %v143_v0  ;;  %v124_v4 = vld [vmem:[%s193_s3] sm:$0xff]  }
   0x4   :  { %v114_v5 = vld [vmem:[%s194_s2] ss:$0 sm:$0xff]  ;;  %v125_v6 = vunpack.c.l.bf16 %v124_v4  ;;  %v126_v10 = vunpack.c.h.bf16 %v124_v4 }
   0x6   :  { %133 = vmatpush3.bf16.msra.mxu0 %v141_v2 }
   0x9   :  { %135 = vmatmul.mubr.msk.bf16.vlgmr.msra.gmra.mrb[0].mxu0 %vm48_vm1, %v142_v3 }
  0xdc   :  { %v86_v7 = vpop.f32.mrb[0].mxu0 }
  0xdd   :  { %v87_v8 = vadd.f32 %v114_v5, %v86_v7  ;;  %v136_v9 = vpop.f32.mrb[1].mxu0 }
  0xde   :  { %v89_v11 = vpop.f32.mrb[2].mxu0 }
  0xdf   :  { %v97_v12 = vadd.f32 %v125_v6, %v87_v8  ;;  %v90_v13 = vadd.f32 %v114_v5, %v89_v11  ;;  %v137_v14 = vpop.f32.mrb[3].mxu0 }
  0xe1   :  { %v121_v15 = vpack.c.bf16 %v97_v12, %v97_v12  ;;  %v98_v16 = vadd.f32 %v126_v10, %v90_v13 }
  0xe3   :  { %108 = vst.msk [vmem:[%s195_s4] sm:$0xf] %vm107_vm2, %v121_v15  ;;  %v122_v17 = vpack.c.bf16 %v98_v16, %v98_v16 }
  0xe5   :  { %109 = vst.msk [vmem:[%s195_s4 + $0x4] sm:$0xf] %vm107_vm2, %v122_v17 }

// kernel: base_model_forward.14
= control target key start
LH: loop header
LB: loop body
LE: loop exit
PB: predicated region body
PF: predicated region fallthrough
CT: control target
= control target key end

     0   :  { %vm25_vm0 = vcmask 261120   ;;  %v213_v16 = vmov 0.0   ;;  %vm214_vm1 = vmmov 0   ;;  %s271_s0 = inlined_call_operand.vmem [shape: bf16[16,32], index: 0, kind: input, shape index: {}]   ;;  %s272_s1 = inlined_call_operand.vmem [shape: bf16[32,128], index: 1, kind: input, shape index: {}]   ;;  %s273_s3 = inlined_call_operand.vmem [shape: f32[1,32], index: 3, kind: input, shape index: {}]   ;;  %s274_s4 = inlined_call_operand.vmem [shape: f32[1,32], index: 4, kind: input, shape index: {}]   ;;  %s275_s2 = inlined_call_operand.vmem [shape: f32[1,128], index: 2, kind: input, shape index: {}]   ;;  %s276_s5 = inlined_call_operand.vmem [shape: bf16[16,128], index: 5, kind: output, shape index: {}]  }
   0x1   :  { %v182_v0 = vld [vmem:[%s271_s0] sm:$0xff]   ;;  %193 = vmatprep.subr.bf16.mxu0 %v213_v16  ;;  %v204_v17 = vld [vmem:[%s272_s1 + $0x8] sm:$0xff]   ;;  %197 = vmatprep.mubr.msk.bf16.mxu0 %vm214_vm1, %v213_v16 }
   0x2   :  { %v183_v1 = vunpack.c.l.bf16 %v182_v0  ;;  %v184_v2 = vunpack.c.h.bf16 %v182_v0  ;;  %v203_v15 = vld [vmem:[%s272_s1] sm:$0xff]  }
   0x3   :  { %194 = vmatpush3.bf16.msra.mxu0 %v203_v15  ;;  %v171_v26 = vld [vmem:[%s273_s3] ss:$0 sm:$0xff] }
   0x4   :  { %v26_v3 = vsel %vm25_vm0, %v183_v1, 0.0  ;;  %v29_v4 = vsel %vm25_vm0, %v184_v2, 0.0  ;;  %195 = vmatprep.subr.bf16.mxu0 %v213_v16  ;;  %v172_v30 = vld [vmem:[%s274_s4] ss:$0 sm:$0xff] }
   0x5   :  { %27 = vadd.xlane.f32.xlu0 %v26_v3  ;;  %v173_v35 = vld [vmem:[%s275_s2] ss:$0 sm:$0xff] }
   0x7   :  { %196 = vmatpush3.bf16.msra.mxu0 %v204_v17 }
   0x9   :  { %30 = vadd.xlane.f32.xlu0 %v29_v4 }
  0x92   :  { %v28_v5 = vpop.xlane.xlu0 %27 }
  0x93   :  { %v33_v6 = vmul.f32 0.03125, %v28_v5 }
  0x95   :  { %v35_v7 = vsub.f32 %v183_v1, %v33_v6 }
  0x96   :  { %v31_v8 = vpop.xlane.xlu0 %30 }
  0x97   :  { %v34_v9 = vmul.f32 0.03125, %v31_v8  ;;  %v37_v10 = vmul.f32 %v35_v7, %v35_v7 }
  0x99   :  { %v36_v11 = vsub.f32 %v184_v2, %v34_v9  ;;  %v39_v12 = vsel %vm25_vm0, %v37_v10, 0.0 }
  0x9a   :  { %40 = vadd.xlane.f32.xlu1 %v39_v12 }
  0x9b   :  { %v38_v13 = vmul.f32 %v36_v11, %v36_v11 }
  0x9d   :  { %v42_v14 = vsel %vm25_vm0, %v38_v13, 0.0 }
  0x9e   :  { %43 = vadd.xlane.f32.xlu1 %v42_v14 }
 0x127   :  { %v41_v18 = vpop.xlane.xlu1 %40 }
 0x128   :  { %v45_v19 = vmul.f32 0.03125, %v41_v18 }
 0x12a   :  { %v47_v20 = vadd.f32 1e-05, %v45_v19 }
 0x12b   :  { %v44_v21 = vpop.xlane.xlu1 %43 }
 0x12c   :  { %205 = vrsqrt.f32 %v47_v20  ;;  %v46_v22 = vmul.f32 0.03125, %v44_v21 }
 0x12e   :  { %v48_v23 = vadd.f32 1e-05, %v46_v22 }
 0x130   :  { %207 = vrsqrt.f32 %v48_v23 }
 0x136   :  { %v206_v24 = vpop.eup %205 }
 0x137   :  { %v51_v25 = vmul.f32 %v206_v24, %v35_v7 }
 0x139   :  { %v60_v29 = vmul.f32 %v171_v26, %v51_v25 }
 0x13a   :  { %v208_v27 = vpop.eup %207 }
 0x13b   :  { %v52_v28 = vmul.f32 %v208_v27, %v36_v11  ;;  %v69_v32 = vadd.f32 %v172_v30, %v60_v29 }
 0x13d   :  { %v61_v31 = vmul.f32 %v171_v26, %v52_v28 }
 0x13f   :  { %v70_v33 = vadd.f32 %v172_v30, %v61_v31 }
 0x141   :  { %v71_v34 = vpack.c.bf16 %v70_v33, %v69_v32 }
 0x143   :  { %198 = vmatmul.mubr.msk.bf16.vlgmr.msra.gmra.mrb[0].mxu0 %vm25_vm0, %v71_v34 }
 0x216   :  { %v132_v36 = vpop.f32.mrb[0].mxu0 }
 0x217   :  { %v133_v37 = vadd.f32 %v173_v35, %v132_v36  ;;  %v199_v38 = vpop.f32.mrb[1].mxu0 }
 0x218   :  { %v135_v39 = vpop.f32.mrb[2].mxu0 }
 0x219   :  { %v143_v40 = vmul.f32 0.044715, %v133_v37  ;;  %v136_v41 = vadd.f32 %v173_v35, %v135_v39  ;;  %v200_v42 = vpop.f32.mrb[3].mxu0  ;;  %v141_v45 = vmul.f32 0.7978846, %v133_v37  ;;  %v139_v55 = vmul.f32 0.5, %v133_v37 }
 0x21b   :  { %v145_v43 = vmul.f32 %v143_v40, %v133_v37  ;;  %v144_v44 = vmul.f32 0.044715, %v136_v41  ;;  %v142_v49 = vmul.f32 0.7978846, %v136_v41  ;;  %v140_v56 = vmul.f32 0.5, %v136_v41 }
 0x21d   :  { %v147_v46 = vadd.f32 1.0, %v145_v43  ;;  %v146_v47 = vmul.f32 %v144_v44, %v136_v41 }
 0x21f   :  { %v149_v48 = vmul.f32 %v147_v46, %v141_v45  ;;  %v148_v50 = vadd.f32 1.0, %v146_v47 }
 0x221   :  { %209 = vtanh.f32 %v149_v48  ;;  %v150_v51 = vmul.f32 %v148_v50, %v142_v49 }
 0x223   :  { %211 = vtanh.f32 %v150_v51 }
 0x22b   :  { %v210_v52 = vpop.eup %209 }
 0x22c   :  { %v153_v53 = vadd.f32 1.0, %v210_v52 }
 0x22d   :  { %v212_v54 = vpop.eup %211 }
 0x22e   :  { %v154_v57 = vadd.f32 1.0, %v212_v54  ;;  %v155_v58 = vmul.f32 %v153_v53, %v139_v55 }
 0x230   :  { %v156_v59 = vmul.f32 %v154_v57, %v140_v56 }
 0x232   :  { %v188_v60 = vpack.c.bf16 %v156_v59, %v155_v58 }
 0x234   :  { %189 = vst [vmem:[%s276_s5] sm:$0xff] %v188_v60  }

// kernel: base_model_forward.12
= control target key start
LH: loop header
LB: loop body
LE: loop exit
PB: predicated region body
PF: predicated region fallthrough
CT: control target
= control target key end

     0   :  { %s1008_s9 = smov 0   ;;  %s1010_s10 = smov 0   ;;  %s1141_s0 = inlined_call_operand.vmem [shape: bf16[2,8,96], index: 0, kind: input, shape index: {}]   ;;  %s1142_s1 = inlined_call_operand.vmem [shape: f32[2,8,8], index: 1, kind: input, shape index: {}]   ;;  %s1143_s2 = inlined_call_operand.vmem [shape: bf16[2,8,32], index: 2, kind: output, shape index: {}]  }
   0x1   :  { %s1012_s11 = smov 0  }
   0x2 LB: > { %s24_s12 = sadd.s32 1, %s971_s10  ;;  %p799_p0 = scmp.ge.s32.totalorder %s975_s11, 1  ;;  %s975_s11 = sphi %s1012_s11, %s12_s11   ;;  %s971_s10 = sphi %s1010_s10, %s1145_s10   ;;  %s967_s9 = sphi %s1008_s9, %s1144_s9  }
   0x3   : > { %p26_p1 = scmp.ge.s32.totalorder %s24_s12, 2  ;;  %p139_p2 = scmp.lt.s32.totalorder %s975_s11, 3 }
   0x5   : > { %s1147_s12 = smov (%p26_p1, %s24_s12), 0  ;;  %p140_p3 = pnand %p799_p0, %p139_p2 }
   0x6   : > { %p169_p4 = scmp.lt.s32.totalorder (!%p140_p3), %s967_s9, 1  ;;  %v977_v0 = vmov (!%p140_p3), 0.0   ;;  %vm978_vm0 = vmmov (!%p140_p3), 0   ;;  %s979_s17 = smov (!%p140_p3), 96   ;;  %vm203_vm1 = vcmask (!%p140_p3), 64512   ;;  %vm270_vm2 = vcmask (!%p140_p3), 1043456  }
   0x7   : > { %143 = sbr.rel (%p140_p3) target bundleno = 1608 (0x648), region = 28  ;;  %842 = vmatprep.subr.bf16.mxu0 (!%p140_p3), %v977_v0  ;;  %844 = vmatprep.mubr.msk.bf16.mxu0 (!%p140_p3), %vm978_vm0, %v977_v0  ;;  %s980_s18 = smov (!%p140_p3), 64   ;;  %vm315_vm3 = vcmask (!%p140_p3), 60416   ;;  %vm445_vm4 = vcmask (!%p140_p3), 126016   ;;  %vm575_vm5 = vcmask (!%p140_p3), 191616   ;;  %vm705_vm6 = vcmask (!%p140_p3), 257216  }
   0x8   : > { %848 = vmatprep.subr.bf16.mxu1 (!%p140_p3), %v977_v0  ;;  %850 = vmatprep.mubr.msk.bf16.mxu1 (!%p140_p3), %vm978_vm0, %v977_v0  ;;  %s981_s19 = smov (!%p140_p3), 88   ;;  %s982_s24 = smov (!%p140_p3), 72  }
   0x9   : > { %s983_s25 = smov (!%p140_p3), 120   ;;  %s984_s26 = smov (!%p140_p3), 80  }
   0xa   : > { %s985_s27 = smov (!%p140_p3), 112   ;;  %s986_s28 = smov (!%p140_p3), 104  }
   0xb   : > { %s987_s4 = smov (!%p140_p3), 56   ;;  %s988_s5 = smov (!%p140_p3), 48  }
   0xc   : > { %s989_s6 = smov (!%p140_p3), 40   ;;  %s990_s7 = smov (!%p140_p3), 8  }
   0xd   : > { %s991_s8 = smov (!%p140_p3), 16  }
   0xe   : > { %s1149_s9 = smov (!%p169_p4, %s967_s9), 1 }
   0xf   : > { %s800_s13 = sshll.u32 %s1149_s9, 2  ;;  %s801_s20 = sshll.u32 %s1149_s9, 3 }
  0x10   : > { %s1040_s16 = scalar_lea.vmem %s1141_s0, %s800_s13  ;;  %s179_s23 = scalar_lea.vmem %s1142_s1, %s801_s20 }
  0x11   : > { %v930_v1 = vld [vmem:[%s1040_s16] ss:$0 sps:$4 sm:$0xff]   ;;  %s1099_s3 = scalar_lea.vmem %s1143_s2, %s800_s13  ;;  %s992_s9 = smov 24  }
  0x12   : > { %201 = vrot.lane.b32.xlu0 %v930_v1, %s979_s17  ;;  %v196_v4 = vld [vmem:[%s1040_s16] sm:$0xf]  ;;  %265 = vrot.lane.b32.xlu1 %v930_v1, %s980_s18 }
  0x13   : > { %v1050_v5 = vld [vmem:[%s1040_s16] ss:$0 sps:$4 sm:$0xff]  }
  0x14   : > { %v1057_v6 = vld [vmem:[%s179_s23] sm:$0xff] }
  0x15   : > { %v190_v7 = vsub.f32 1.0, %v1057_v6  ;;  %v1066_v17 = vld [vmem:[%s1040_s16] ss:$0 sps:$4 sm:$0xff]  }
  0x16   : > { %327 = vrot.lane.b32.xlu1 %v1050_v5, %s981_s19  ;;  %v932_v25 = vld [vmem:[%s1040_s16] ss:$0 sps:$4 sm:$0xff]  }
  0x17   : > { %v1060_v11 = vmul.f32 -10000.0, %v190_v7  ;;  %v1074_v26 = vld [vmem:[%s1040_s16] ss:$0 sps:$4 sm:$0xff]  }
  0x18   : > { %v935_v27 = vld [vmem:[%s1040_s16] ss:$0 sps:$4 sm:$0xff]  }
  0x19   : > { %v936_v28 = vld [vmem:[%s1040_s16] ss:$0 sps:$4 sm:$0xff]  }
  0x84   : > { %v202_v2 = vpop.permute.xlu0 %201  ;;  %v266_v18 = vpop.permute.xlu1 %265 }
  0x85   : > { %v208_v3 = vsel %vm203_vm1, %v202_v2, 0  ;;  %v272_v19 = vsel %vm270_vm2, %v266_v18, 0 }
  0x86   : > { %843 = vmatpush3.bf16.xpose.msra.mxu0 %v208_v3  ;;  %849 = vmatpush3.bf16.msra.mxu1 %v272_v19 }
  0x87   : > { %860 = vmatprep.subr.bf16.mxu0 %v977_v0  ;;  %854 = vmatprep.subr.bf16.mxu1 %v977_v0 }
  0x88   : > { %v328_v29 = vpop.permute.xlu1 %327 }
  0x89   : > { %v333_v35 = vsel %vm203_vm1, %v328_v29, 0 }
  0x8d   : > { %845 = vmatmul.mubr.msk.bf16.vlgmr.msra.gmra.mrb[0].mxu0 %vm203_vm1, %v196_v4 }
  0x8e   : > { %862 = vmatprep.mubr.msk.bf16.mxu0 %vm978_vm0, %v977_v0 }
 0x160   : > { %v244_v8 = vpop.f32.mrb[0].mxu0 }
 0x161   : > { %v250_v9 = vmul.f32 0.35355338, %v244_v8  ;;  %v846_v10 = vpop.f32.mrb[1].mxu0 }
 0x162   : > { %v247_v12 = vpop.f32.mrb[2].mxu0 }
 0x163   : > { %v251_v13 = vmul.f32 %v250_v9, %v1057_v6  ;;  %v847_v14 = vpop.f32.mrb[3].mxu0 }
 0x165   : > { %v252_v15 = vadd.f32 %v251_v13, %v1060_v11 }
 0x167   : > { %v253_v16 = vsel %vm203_vm1, %v252_v15, -inf }
 0x168   : > { %254 = vmax.xlane.f32.xlu0 %v253_v16 }
 0x17e   : > { %587 = vrot.lane.b32.xlu0 %v1066_v17, %s982_s24 }
 0x1f5   : > { %v255_v20 = vpop.xlane.xlu0 %254 }
 0x1f6   : > { %v256_v21 = vsub.f32 %v252_v15, %v255_v20 }
 0x1f8   : > { %v257_v22 = vmul.f32 1.442695, %v256_v21 }
 0x1f9   : > { %v588_v38 = vpop.permute.xlu0 %587 }
 0x1fa   : > { %937 = vpow2.f32 %v257_v22  ;;  %v593_v40 = vsel %vm203_vm1, %v588_v38, 0 }
 0x204   : > { %v938_v23 = vpop.eup %937 }
 0x205   : > { %v259_v24 = vsel %vm203_vm1, %v938_v23, 0.0 }
 0x206   : > { %260 = vadd.xlane.f32.xlu1 %v259_v24 }
 0x217   : > { %322 = vrot.lane.b32.xlu1 %v932_v25, %s983_s25 }
 0x21b   : > { %457 = vrot.lane.b32.xlu1 %v1074_v26, %s984_s26 }
 0x21f   : > { %452 = vrot.lane.b32.xlu1 %v935_v27, %s985_s27 }
 0x223   : > { %582 = vrot.lane.b32.xlu1 %v936_v28, %s986_s28 }
 0x293   : > { %v261_v30 = vpop.xlane.xlu1 %260 }
 0x294   : > { %939 = vrcp.f32 %v261_v30 }
 0x297   : > { %v323_v33 = vpop.permute.xlu1 %322 }
 0x29b   : > { %v458_v36 = vpop.permute.xlu1 %457 }
 0x29c   : > { %v463_v37 = vsel %vm203_vm1, %v458_v36, 0 }
 0x29e   : > { %v940_v31 = vpop.eup %939 }
 0x29f   : > { %v263_v32 = vmul.f32 %v940_v31, %v938_v23  ;;  %v453_v39 = vpop.permute.xlu1 %452 }
 0x2a1   : > { %v264_v34 = vpack.c.bf16 %v263_v32, %v263_v32 }
 0x2a3   : > { %851 = vmatmul.mubr.msk.bf16.vlgmr.msra.gmra.mrb[0].mxu1 %vm203_vm1, %v264_v34  ;;  %v583_v41 = vpop.permute.xlu1 %582 }
 0x2a4   : > { %855 = vmatpush3.bf16.xpose.msra.mxu1 %v333_v35  ;;  %856 = vmatprep.mubr.msk.bf16.mxu1 %vm978_vm0, %v977_v0 }
 0x2a5   : > { %866 = vmatprep.subr.bf16.mxu1 %v977_v0 }
 0x2ab   : > { %857 = vmatmul.mubr.msk.bf16.vlgmr.msra.gmra.mrb[4].mxu1 %vm203_vm1, %v323_v33 }
 0x2ac   : > { %867 = vmatpush3.bf16.xpose.msra.mxu1 %v463_v37  ;;  %868 = vmatprep.mubr.msk.bf16.mxu1 %vm978_vm0, %v977_v0 }
 0x2ad   : > { %878 = vmatprep.subr.bf16.mxu1 %v977_v0 }
 0x2b3   : > { %869 = vmatmul.mubr.msk.bf16.vlgmr.msra.gmra.mrb[8].mxu1 %vm203_vm1, %v453_v39 }
 0x2b4   : > { %879 = vmatpush3.bf16.xpose.msra.mxu1 %v593_v40  ;;  %880 = vmatprep.mubr.msk.bf16.mxu1 %vm978_vm0, %v977_v0 }
 0x2bb   : > { %881 = vmatmul.mubr.msk.bf16.vlgmr.msra.gmra.mrb[12].mxu1 %vm203_vm1, %v583_v41 }
 0x376   : > { %v308_v42 = vpop.f32.mrb[0].mxu1 }
 0x377   : > { %v314_v43 = vpack.c.bf16 %v308_v42, %v308_v42  ;;  %v852_v44 = vpop.f32.mrb[1].mxu1 }
 0x378   : > { %v311_v45 = vpop.f32.mrb[2].mxu1 }
 0x379   : > { %316 = vst.msk [vmem:[%s1099_s3] sm:$0xf] %vm315_vm3, %v314_v43  ;;  %v853_v46 = vpop.f32.mrb[3].mxu1 }
 0x37e   : > { %v369_v47 = vpop.f32.mrb[4].mxu1 }
 0x37f   : > { %v375_v48 = vmul.f32 0.35355338, %v369_v47  ;;  %v858_v49 = vpop.f32.mrb[5].mxu1 }
 0x380   : > { %v372_v50 = vpop.f32.mrb[6].mxu1 }
 0x381   : > { %v376_v51 = vmul.f32 %v375_v48, %v1057_v6  ;;  %v859_v52 = vpop.f32.mrb[7].mxu1 }
 0x383   : > { %v377_v53 = vadd.f32 %v376_v51, %v1060_v11 }
 0x385   : > { %v378_v54 = vsel %vm203_vm1, %v377_v53, -inf }
 0x386   : > { %379 = vmax.xlane.f32.xlu1 %v378_v54  ;;  %v499_v55 = vpop.f32.mrb[8].mxu1 }
 0x387   : > { %v505_v56 = vmul.f32 0.35355338, %v499_v55  ;;  %v870_v57 = vpop.f32.mrb[9].mxu1 }
 0x388   : > { %v502_v58 = vpop.f32.mrb[10].mxu1 }
 0x389   : > { %v506_v59 = vmul.f32 %v505_v56, %v1057_v6  ;;  %v871_v60 = vpop.f32.mrb[11].mxu1 }
 0x38b   : > { %v507_v61 = vadd.f32 %v506_v59, %v1060_v11 }
 0x38d   : > { %v508_v62 = vsel %vm203_vm1, %v507_v61, -inf }
 0x38e   : > { %509 = vmax.xlane.f32.xlu0 %v508_v62  ;;  %v629_v63 = vpop.f32.mrb[12].mxu1 }
 0x38f   : > { %v635_v1 = vmul.f32 0.35355338, %v629_v63  ;;  %v882_v2 = vpop.f32.mrb[13].mxu1 }
 0x390   : > { %v632_v3 = vpop.f32.mrb[14].mxu1 }
 0x391   : > { %v636_v4 = vmul.f32 %v635_v1, %v1057_v6  ;;  %v883_v7 = vpop.f32.mrb[15].mxu1 }
 0x393   : > { %v637_v8 = vadd.f32 %v636_v4, %v1060_v11 }
 0x395   : > { %v638_v9 = vsel %vm203_vm1, %v637_v8, -inf }
 0x396   : > { %639 = vmax.xlane.f32.xlu1 %v638_v9 }
 0x413   : > { %v380_v10 = vpop.xlane.xlu1 %379 }
 0x414   : > { %v381_v12 = vsub.f32 %v377_v53, %v380_v10 }
 0x416   : > { %v382_v13 = vmul.f32 1.442695, %v381_v12 }
 0x418   : > { %941 = vpow2.f32 %v382_v13 }
 0x41b   : > { %v510_v11 = vpop.xlane.xlu0 %509 }
 0x41c   : > { %v511_v21 = vsub.f32 %v507_v61, %v510_v11 }
 0x41e   : > { %v512_v22 = vmul.f32 1.442695, %v511_v21 }
 0x422   : > { %v942_v14 = vpop.eup %941 }
 0x423   : > { %v640_v15 = vpop.xlane.xlu1 %639  ;;  %v384_v16 = vsel %vm203_vm1, %v942_v14, 0.0 }
 0x424   : > { %v641_v18 = vsub.f32 %v637_v8, %v640_v15  ;;  %385 = vadd.xlane.f32.xlu1 %v384_v16 }
 0x426   : > { %v642_v19 = vmul.f32 1.442695, %v641_v18 }
 0x428   : > { %943 = vpow2.f32 %v642_v19 }
 0x429   : > { %945 = vpow2.f32 %v512_v22 }
 0x432   : > { %v944_v20 = vpop.eup %943 }
 0x433   : > { %v644_v6 = vsel %vm203_vm1, %v944_v20, 0.0  ;;  %v946_v23 = vpop.eup %945 }
 0x434   : > { %645 = vadd.xlane.f32.xlu0 %v644_v6  ;;  %v514_v24 = vsel %vm203_vm1, %v946_v23, 0.0 }
 0x435   : > { %390 = vrot.lane.b32.xlu1 %v1050_v5, %s987_s4 }
 0x44a   : > { %520 = vrot.lane.b32.xlu0 %v1074_v26, %s988_s5 }
 0x459   : > { %515 = vadd.xlane.f32.xlu1 %v514_v24 }
 0x46a   : > { %650 = vrot.lane.b32.xlu1 %v1066_v17, %s989_s6 }
 0x4b1   : > { %v386_v25 = vpop.xlane.xlu1 %385 }
 0x4b2   : > { %947 = vrcp.f32 %v386_v25 }
 0x4b5   : > { %v391_v27 = vpop.permute.xlu1 %390 }
 0x4b6   : > { %v396_v28 = vsel %vm270_vm2, %v391_v27, 0 }
 0x4b7   : > { %861 = vmatpush3.bf16.msra.mxu0 %v396_v28 }
 0x4b8   : > { %872 = vmatprep.subr.bf16.mxu0 %v977_v0 }
 0x4bc   : > { %v948_v5 = vpop.eup %947 }
 0x4bd   : > { %v388_v29 = vmul.f32 %v948_v5, %v942_v14 }
 0x4bf   : > { %v389_v30 = vpack.c.bf16 %v388_v29, %v388_v29 }
 0x4c1   : > { %863 = vmatmul.mubr.msk.bf16.vlgmr.msra.gmra.mrb[4].mxu0 %vm203_vm1, %v389_v30  ;;  %v646_v26 = vpop.xlane.xlu0 %645 }
 0x4c2   : > { %874 = vmatprep.mubr.msk.bf16.mxu0 %vm978_vm0, %v977_v0 }
 0x4c5   : > { %v521_v31 = vpop.permute.xlu0 %520 }
 0x4c6   : > { %v526_v17 = vsel %vm270_vm2, %v521_v31, 0 }
 0x4c7   : > { %873 = vmatpush3.bf16.msra.mxu0 %v526_v17 }
 0x4c8   : > { %884 = vmatprep.subr.bf16.mxu0 %v977_v0 }
 0x4e6   : > { %v516_v32 = vpop.xlane.xlu1 %515 }
 0x4e7   : > { %949 = vrcp.f32 %v516_v32 }
 0x4e8   : > { %951 = vrcp.f32 %v646_v26 }
 0x4ea   : > { %v651_v34 = vpop.permute.xlu1 %650 }
 0x4eb   : > { %v656_v36 = vsel %vm270_vm2, %v651_v34, 0 }
 0x4f1   : > { %v950_v33 = vpop.eup %949 }
 0x4f2   : > { %v518_v35 = vmul.f32 %v950_v33, %v946_v23  ;;  %v952_v38 = vpop.eup %951 }
 0x4f3   : > { %v648_v39 = vmul.f32 %v952_v38, %v944_v20 }
 0x4f4   : > { %v519_v37 = vpack.c.bf16 %v518_v35, %v518_v35 }
 0x4f5   : > { %v649_v40 = vpack.c.bf16 %v648_v39, %v648_v39 }
 0x4f6   : > { %875 = vmatmul.mubr.msk.bf16.vlgmr.msra.gmra.mrb[8].mxu0 %vm203_vm1, %v519_v37 }
 0x4f7   : > { %885 = vmatpush3.bf16.msra.mxu0 %v656_v36  ;;  %886 = vmatprep.mubr.msk.bf16.mxu0 %vm978_vm0, %v977_v0 }
 0x4fe   : > { %887 = vmatmul.mubr.msk.bf16.vlgmr.msra.gmra.mrb[12].mxu0 %vm203_vm1, %v649_v40 }
 0x594   : > { %v432_v41 = vpop.f32.mrb[4].mxu0 }
 0x595   : > { %v823_v42 = vpack.c.bf16 %v432_v41, %v432_v41  ;;  %v864_v43 = vpop.f32.mrb[5].mxu0 }
 0x596   : > { %v435_v44 = vpop.f32.mrb[6].mxu0 }
 0x597   : > { %442 = vrot.lane.b32.xlu1 %v823_v42, %s990_s7  ;;  %v865_v45 = vpop.f32.mrb[7].mxu0 }
 0x5c9   : > { %v562_v46 = vpop.f32.mrb[8].mxu0 }
 0x5ca   : > { %v824_v47 = vpack.c.bf16 %v562_v46, %v562_v46  ;;  %v876_v48 = vpop.f32.mrb[9].mxu0 }
 0x5cb   : > { %v565_v49 = vpop.f32.mrb[10].mxu0 }
 0x5cc   : > { %572 = vrot.lane.b32.xlu0 %v824_v47, %s991_s8  ;;  %v877_v0 = vpop.f32.mrb[11].mxu0 }
 0x5d1   : > { %v692_v50 = vpop.f32.mrb[12].mxu0 }
 0x5d2   : > { %v825_v51 = vpack.c.bf16 %v692_v50, %v692_v50  ;;  %v888_v52 = vpop.f32.mrb[13].mxu0 }
 0x5d3   : > { %v695_v53 = vpop.f32.mrb[14].mxu0 }
 0x5d4   : > { %702 = vrot.lane.b32.xlu1 %v825_v51, %s992_s9  ;;  %v889_v54 = vpop.f32.mrb[15].mxu0 }
 0x609   : > { %v443_v55 = vpop.permute.xlu1 %442 }
 0x60a   : > { %446 = vst.msk [vmem:[%s1099_s3] sm:$0xf] %vm445_vm4, %v443_v55 }
 0x63e   : > { %v573_v56 = vpop.permute.xlu0 %572 }
 0x63f   : > { %576 = vst.msk [vmem:[%s1099_s3] sm:$0xf] %vm575_vm5, %v573_v56 }
 0x646   : > { %v703_v57 = vpop.permute.xlu1 %702 }
 0x647   : > { %706 = vst.msk [vmem:[%s1099_s3] sm:$0xf] %vm705_vm6, %v703_v57 }
 0x648 PF: > { %s12_s11 = sadd.s32 1, %s975_s11   ;;  %s1144_s9 = smov %s971_s10 }
 0x649   : > { %p9_p5 = scmp.ge.s32.totalorder %s12_s11, 4   ;;  %s1145_s10 = smov %s1147_s12 }
 0x64b   :  { %11 = sbr.rel (!%p9_p5) target bundleno = 2 (0x2), region = 62 }

// kernel: base_model_forward.15
= control target key start
LH: loop header
LB: loop body
LE: loop exit
PB: predicated region body
PF: predicated region fallthrough
CT: control target
= control target key end

     0   :  { %v217_v0 = vmov 0.0   ;;  %vm218_vm0 = vmmov 0   ;;  %vm152_vm1 = vcmask 257024   ;;  %s283_s1 = inlined_call_operand.vmem [shape: bf16[128,32], index: 1, kind: input, shape index: {}]   ;;  %s284_s0 = inlined_call_operand.vmem [shape: bf16[16,128], index: 0, kind: input, shape index: {}]   ;;  %s285_s3 = inlined_call_operand.vmem [shape: bf16[16,32], index: 3, kind: input, shape index: {}]   ;;  %s286_s2 = inlined_call_operand.vmem [shape: f32[1,32], index: 2, kind: input, shape index: {}]   ;;  %s287_s4 = inlined_call_operand.vmem [shape: bf16[16,32], index: 4, kind: output, shape index: {}]  }
   0x1   :  { %186 = vmatprep.subr.bf16.mxu0 %v217_v0  ;;  %v208_v1 = vld [vmem:[%s283_s1] sm:$0xff]   ;;  %202 = vmatprep.mubr.msk.bf16.mxu0 %vm218_vm0, %v217_v0  ;;  %v209_v2 = vld [vmem:[%s283_s1 + $0x8] sm:$0xff]   ;;  %v210_v3 = vld [vmem:[%s283_s1 + $0x10] sm:$0xff]  }
   0x2   :  { %187 = vmatpush3.bf16.msra.mxu0 %v208_v1  ;;  %v211_v4 = vld [vmem:[%s283_s1 + $0x18] sm:$0xff]   ;;  %v212_v5 = vld [vmem:[%s283_s1 + $0x20] sm:$0xff]   ;;  %v213_v6 = vld [vmem:[%s283_s1 + $0x28] sm:$0xff]  }
   0x3   :  { %188 = vmatprep.subr.bf16.mxu0 %v217_v0  ;;  %v214_v7 = vld [vmem:[%s283_s1 + $0x30] sm:$0xff]   ;;  %v215_v8 = vld [vmem:[%s283_s1 + $0x38] sm:$0xff]   ;;  %v216_v9 = vld [vmem:[%s284_s0] sm:$0xff]  }
   0x4   :  { %v174_v10 = vld [vmem:[%s285_s3] sm:$0xff]  }
   0x5   :  { %v159_v11 = vld [vmem:[%s286_s2] ss:$0 sm:$0xff]  ;;  %v175_v12 = vunpack.c.l.bf16 %v174_v10  ;;  %v176_v16 = vunpack.c.h.bf16 %v174_v10 }
   0x6   :  { %189 = vmatpush3.bf16.msra.mxu0 %v209_v2 }
   0x7   :  { %190 = vmatprep.subr.bf16.mxu0 %v217_v0 }
   0xa   :  { %191 = vmatpush3.bf16.msra.mxu0 %v210_v3 }
   0xb   :  { %192 = vmatprep.subr.bf16.mxu0 %v217_v0 }
   0xe   :  { %193 = vmatpush3.bf16.msra.mxu0 %v211_v4 }
   0xf   :  { %194 = vmatprep.subr.bf16.mxu0 %v217_v0 }
  0x12   :  { %195 = vmatpush3.bf16.msra.mxu0 %v212_v5 }
  0x13   :  { %196 = vmatprep.subr.bf16.mxu0 %v217_v0 }
  0x16   :  { %197 = vmatpush3.bf16.msra.mxu0 %v213_v6 }
  0x17   :  { %198 = vmatprep.subr.bf16.mxu0 %v217_v0 }
  0x1a   :  { %199 = vmatpush3.bf16.msra.mxu0 %v214_v7 }
  0x1b   :  { %200 = vmatprep.subr.bf16.mxu0 %v217_v0 }
  0x1e   :  { %201 = vmatpush3.bf16.msra.mxu0 %v215_v8 }
  0x21   :  { %203 = vmatmul.mubr.bf16.vlgmr.msra.gmra.mrb[0].mxu0 %v216_v9 }
  0xf4   :  { %v131_v13 = vpop.f32.mrb[0].mxu0 }
  0xf5   :  { %v132_v14 = vadd.f32 %v159_v11, %v131_v13  ;;  %v204_v15 = vpop.f32.mrb[1].mxu0 }
  0xf6   :  { %v134_v17 = vpop.f32.mrb[2].mxu0 }
  0xf7   :  { %v142_v18 = vadd.f32 %v175_v12, %v132_v14  ;;  %v135_v19 = vadd.f32 %v159_v11, %v134_v17  ;;  %v205_v20 = vpop.f32.mrb[3].mxu0 }
  0xf9   :  { %v171_v21 = vpack.c.bf16 %v142_v18, %v142_v18  ;;  %v143_v22 = vadd.f32 %v176_v16, %v135_v19 }
  0xfb   :  { %153 = vst.msk [vmem:[%s287_s4] sm:$0xf] %vm152_vm1, %v171_v21  ;;  %v172_v23 = vpack.c.bf16 %v143_v22, %v143_v22 }
  0xfd   :  { %154 = vst.msk [vmem:[%s287_s4 + $0x4] sm:$0xf] %vm152_vm1, %v172_v23 }

// kernel: base_model_forward.21
= control target key start
LH: loop header
LB: loop body
LE: loop exit
PB: predicated region body
PF: predicated region fallthrough
CT: control target
= control target key end

     0   :  { %vm23_vm0 = vcmask 261120   ;;  %s310_s0 = inlined_call_operand.vmem [shape: bf16[16,32], index: 0, kind: input, shape index: {}]   ;;  %s311_s1 = inlined_call_operand.vmem [shape: bf16[64,32], index: 1, kind: input, shape index: {}]   ;;  %s312_s2 = inlined_call_operand.vmem [shape: f32[1,32], index: 2, kind: input, shape index: {}]   ;;  %s313_s3 = inlined_call_operand.vmem [shape: f32[1,32], index: 3, kind: input, shape index: {}]   ;;  %s314_s4 = inlined_call_operand.hbm [shape: f32[16,64], index: 4, kind: output, shape index: {}]  }
   0x1   :  { %v181_v0 = vld [vmem:[%s310_s0] sm:$0xff]  }
   0x2   :  { %v182_v1 = vunpack.c.l.bf16 %v181_v0  ;;  %v183_v2 = vunpack.c.h.bf16 %v181_v0 }
   0x4   :  { %v24_v3 = vsel %vm23_vm0, %v182_v1, 0.0 }
   0x5   :  { %9 = vsyncpa [#allocation3], 0  ;;  %25 = vadd.xlane.f32.xlu0 %v24_v3  ;;  %v27_v4 = vsel %vm23_vm0, %v183_v2, 0.0  ;;  %v206_v5 = vld [vmem:[%s311_s1] sm:$0xff]   ;;  %v238_v6 = vmov 0.0   ;;  %v207_v18 = vld [vmem:[%s311_s1 + $0x8] sm:$0xff]  }
   0x6   :  { %189 = vmatprep.subr.bf16.mxu0 %v238_v6  ;;  %v102_v7 = vsel %vm23_vm0, %v206_v5, 0  ;;  %v105_v19 = vsel %vm23_vm0, %v207_v18, 0  ;;  %v208_v20 = vld [vmem:[%s311_s1 + $0x10] sm:$0xff]   ;;  %v209_v22 = vld [vmem:[%s311_s1 + $0x18] sm:$0xff]   ;;  %vm239_vm1 = vmmov 0   ;;  %s240_s27 = smov [#allocation2]  }
   0x7   :  { %190 = vmatpush3.bf16.xpose.msra.mxu0 %v102_v7  ;;  %v108_v21 = vsel %vm23_vm0, %v208_v20, 0  ;;  %v111_v23 = vsel %vm23_vm0, %v209_v22, 0  ;;  %197 = vmatprep.mubr.msk.bf16.mxu0 %vm239_vm1, %v238_v6  ;;  %v173_v32 = vld [vmem:[%s312_s2] ss:$0 sm:$0xff]  ;;  %s162_s28 = sshll.u32 %s240_s27, 4  ;;  %vm154_vm2 = vcmask 523264   ;;  %s163_s28 = int_to_ptr.vmem [resolvable:$true] %s162_s28 }
   0x8   :  { %191 = vmatprep.subr.bf16.mxu0 %v238_v6  ;;  %v174_v36 = vld [vmem:[%s313_s3] ss:$0 sm:$0xff]  ;;  %s214_s2 = scalar_lea.vmem %s163_s28, 256  ;;  %p219_p1 = scmp.lt.s32.totalorder %s163_s28, %s163_s28 }
   0x9   :  { %28 = vadd.xlane.f32.xlu0 %v27_v4  ;;  %p215_p0 = scmp.ne.s32.totalorder %s163_s28, %s214_s2  ;;  %p220_p2 = scmp.lt.s32.totalorder %s214_s2, %s214_s2 }
   0xb   :  { %p221_p3 = por %p220_p2, %p219_p1 }
   0xd   :  { %p222_p4 = pnand %p221_p3, %p215_p0 }
   0xf   :  { %192 = vmatpush3.bf16.xpose.msra.mxu0 %v105_v19 }
  0x10   :  { %193 = vmatprep.subr.bf16.mxu0 %v238_v6 }
  0x17   :  { %194 = vmatpush3.bf16.xpose.msra.mxu0 %v108_v21 }
  0x18   :  { %195 = vmatprep.subr.bf16.mxu0 %v238_v6 }
  0x1f   :  { %196 = vmatpush3.bf16.xpose.msra.mxu0 %v111_v23 }
  0x92   :  { %v26_v8 = vpop.xlane.xlu0 %25 }
  0x93   :  { %v31_v9 = vmul.f32 0.03125, %v26_v8 }
  0x95   :  { %v33_v10 = vsub.f32 %v182_v1, %v31_v9 }
  0x96   :  { %v29_v11 = vpop.xlane.xlu0 %28 }
  0x97   :  { %v32_v12 = vmul.f32 0.03125, %v29_v11  ;;  %v35_v13 = vmul.f32 %v33_v10, %v33_v10 }
  0x99   :  { %v34_v14 = vsub.f32 %v183_v2, %v32_v12  ;;  %v37_v15 = vsel %vm23_vm0, %v35_v13, 0.0 }
  0x9a   :  { %38 = vadd.xlane.f32.xlu1 %v37_v15 }
  0x9b   :  { %v36_v16 = vmul.f32 %v34_v14, %v34_v14 }
  0x9d   :  { %v40_v17 = vsel %vm23_vm0, %v36_v16, 0.0 }
  0x9e   :  { %41 = vadd.xlane.f32.xlu1 %v40_v17 }
 0x127   :  { %v39_v24 = vpop.xlane.xlu1 %38 }
 0x128   :  { %v43_v25 = vmul.f32 0.03125, %v39_v24 }
 0x12a   :  { %v45_v26 = vadd.f32 1e-05, %v43_v25 }
 0x12b   :  { %v42_v27 = vpop.xlane.xlu1 %41 }
 0x12c   :  { %210 = vrsqrt.f32 %v45_v26  ;;  %v44_v28 = vmul.f32 0.03125, %v42_v27 }
 0x12e   :  { %v46_v29 = vadd.f32 1e-05, %v44_v28 }
 0x130   :  { %212 = vrsqrt.f32 %v46_v29 }
 0x136   :  { %v211_v30 = vpop.eup %210 }
 0x137   :  { %v49_v31 = vmul.f32 %v211_v30, %v33_v10 }
 0x139   :  { %v58_v35 = vmul.f32 %v173_v32, %v49_v31 }
 0x13a   :  { %v213_v33 = vpop.eup %212 }
 0x13b   :  { %v50_v34 = vmul.f32 %v213_v33, %v34_v14  ;;  %v67_v38 = vadd.f32 %v174_v36, %v58_v35 }
 0x13d   :  { %v59_v37 = vmul.f32 %v173_v32, %v50_v34 }
 0x13f   :  { %v68_v39 = vadd.f32 %v174_v36, %v59_v37 }
 0x141   :  { %v69_v40 = vpack.c.bf16 %v68_v39, %v67_v38 }
 0x143   :  { %198 = vmatmul.mubr.msk.bf16.vlgmr.msra.gmra.mrb[0].mxu0 %vm23_vm0, %v69_v40 }
 0x216   :  { %v147_v41 = vpop.f32.mrb[0].mxu0 }
 0x217   :  { %155 = vst.msk [vmem:[#allocation2] sm:$0xff] %vm154_vm2, %v147_v41  ;;  %v199_v42 = vpop.f32.mrb[1].mxu0 }
 0x218   :  { %v150_v43 = vpop.f32.mrb[2].mxu0 }
 0x219   :  { %156 = vst.msk [vmem:[#allocation2 + $0x8] sm:$0xff] %vm154_vm2, %v150_v43  ;;  %v200_v44 = vpop.f32.mrb[3].mxu0 }
 0x21a   :  { %225 = shalt.err (!%p222_p4)
}
 0x21b   :  { %s226_s30 = scalar_lea.hbm %s314_s4, 256 }
 0x21c   :  { %p227_p5 = scmp.ne.s32.totalorder %s314_s4, %s226_s30  ;;  %p230_p6 = scmp.lt.u32.totalorder %s226_s30, %s314_s4 }
 0x21e   :  { %p232_p7 = pnand %p230_p6, %p227_p5 }
 0x220   :  { %235 = shalt.err (!%p232_p7)
}
 0x221   :  { %s241_s9 = smov 128   ;;  %s242_s10 = smov 8  }
 0x222   :  { %168 = dma.vmem_to_hbm [thread:$0]  %s163_s28, 256, %s314_s4, [#allocation3], %s241_s9, %s241_s9, %s242_s10  }
 0x223   :  { %236 = dma.done.wait [#allocation3], 256  }
 0x224   :  { %237 = vsyncadd [#allocation3], 4294967040 }
 0x225   :  { %172 = vsyncpa [#allocation3], 1 }

</bundles_post_ra>
